<compile_context>
chip_gen: v7x
topology: tpu7x:2x2x1
jax: 0.10.0
libtpu: 0.0.40
codegen_flags: <defaults>
</compile_context>

<pallas_src>
import jax
import jax.numpy as jnp
from jax.experimental import pallas as pl
from jax.experimental.pallas import tpu as pltpu

LANE = 128
SUBLANE = 8


def _round_up(x, m):
    return (x + m - 1) // m * m


# ----------------------------- Pallas kernel --------------------------------

def _rgcn_fused_kernel(x_ref, adj_ref, invdeg_ref,
                       w1_root_ref, w1_rel_ref, b1_ref,
                       w2_root_ref, w2_rel_ref, b2_ref,
                       pool_ref, w_lin_ref, b_lin_ref,
                       out_ref):
    """Whole forward pass, resident in VMEM.

    x:        [Np, Dp]     bf16  zero-padded node features
    adj:      [R*Np, Np]   bf16  vstack_r(A_r), A_r[i,j] = #edges j->i (exact)
    invdeg:   [R*Np, 1]    f32   1/deg_r(i) (0 where deg==0 / padded rows)
    w*_root:  [Dp, Dp]     bf16
    w*_rel:   [R*Dp, Dp]   bf16  vstack_r(W_r)
    b*:       [1, Dp]      f32
    pool:     [Gp, Np]     bf16  mean-pool matrix
    w_lin:    [Dp, Cp]     bf16
    b_lin:    [1, Cp]      f32
    out:      [Gp, Cp]     f32
    """
    n = x_ref.shape[0]                 # padded node count (static)
    dp = x_ref.shape[1]                # padded feature dim (static)
    r = adj_ref.shape[0] // n          # number of relations (static)

    def rgcn_layer(h_bf16, w_root_ref, w_rel_ref, b_ref):
        # self / root term (bf16 x bf16 -> f32 accumulate on the MXU)
        acc = jnp.dot(h_bf16, w_root_ref[...],
                      preferred_element_type=jnp.float32)
        # relation aggregation: ONE matmul over the vertically stacked exact
        # 0/1 adjacency (read adj_ref here, per layer, to keep live ranges
        # short):  [R*Np, Np] @ [Np, Dp] -> [R*Np, Dp]
        agg = jnp.dot(adj_ref[...], h_bf16,
                      preferred_element_type=jnp.float32)
        # mean normalisation as an f32 per-row scale (VPU; hides under MXU).
        agg = agg * invdeg_ref[...]
        # per-relation weight application, unrolled accumulation: same total
        # MXU work as a stacked [Np, R*Dp] @ [R*Dp, Dp], no concat copies.
        for k in range(r):
            acc = acc + jnp.dot(
                agg[k * n:(k + 1) * n, :].astype(jnp.bfloat16),
                w_rel_ref[k * dp:(k + 1) * dp, :],
                preferred_element_type=jnp.float32)
        # bias + ReLU in f32. Dropout is identity in eval mode.
        # TODO(synk): training-mode dropout (stochastic masking) not applied.
        return jnp.maximum(acc + b_ref[...], 0.0)

    h1 = rgcn_layer(x_ref[...], w1_root_ref, w1_rel_ref, b1_ref)
    h2 = rgcn_layer(h1.astype(jnp.bfloat16), w2_root_ref, w2_rel_ref, b2_ref)

    # global_mean_pool + final Linear (bf16 MXU operands, f32 accumulation)
    pooled = jnp.dot(pool_ref[...], h2.astype(jnp.bfloat16),
                     preferred_element_type=jnp.float32)
    out_ref[...] = (jnp.dot(pooled.astype(jnp.bfloat16), w_lin_ref[...],
                            preferred_element_type=jnp.float32)
                    + b_lin_ref[...])


# -------------------- one-time parameter preparation -------------------------

def prepare_params(params):
    """Pad / stack / cast the weights ONCE (off the per-call path)."""
    d_in, d_hid = params["w1_root"].shape
    n_cls = params["w_lin"].shape[1]
    r = params["w1_rel"].shape[0]
    dp = _round_up(max(d_in, d_hid), LANE)
    cp = _round_up(n_cls, LANE)
    bf16, f32 = jnp.bfloat16, jnp.float32

    def pad2(a, rows, cols, dtype):
        return jnp.pad(a, ((0, rows - a.shape[0]),
                           (0, cols - a.shape[1]))).astype(dtype)

    def stack_rel(w_rel):      # [R, Din, Dout] -> [R*Dp, Dp]
        w = jnp.pad(w_rel, ((0, 0),
                            (0, dp - w_rel.shape[1]),
                            (0, dp - w_rel.shape[2])))
        return w.reshape(r * dp, dp).astype(bf16)

    return {
        "w1_root": pad2(params["w1_root"], dp, dp, bf16),
        "w1_rel":  stack_rel(params["w1_rel"]),
        "b1":      pad2(params["b1"], 1, dp, f32),
        "w2_root": pad2(params["w2_root"], dp, dp, bf16),
        "w2_rel":  stack_rel(params["w2_rel"]),
        "b2":      pad2(params["b2"], 1, dp, f32),
        "w_lin":   pad2(params["w_lin"], dp, cp, bf16),
        "b_lin":   pad2(params["b_lin"], 1, cp, f32),
    }


# ------------------------------ per-call wrapper ------------------------------

def rgcn_forward(prepped, num_classes, x, adj_counts, pool):
    """x: [N, Din] f32, adj_counts: [R, N, N] f32 exact edge counts,
    pool: [G, N] f32 mean-pool matrix (all unpadded)."""
    n = x.shape[0]
    r = adj_counts.shape[0]
    g = pool.shape[0]
    dp = prepped["w1_root"].shape[0]
    cp = prepped["w_lin"].shape[1]
    np_ = _round_up(n, LANE)
    gp = _round_up(g, SUBLANE)
    bf16, f32 = jnp.bfloat16, jnp.float32

    # ---- graph-dependent prep only (jnp.pad, no zeros + scatter) ------------
    x_p = jnp.pad(x, ((0, np_ - n), (0, dp - x.shape[1]))).astype(bf16)
    adj_p = jnp.pad(adj_counts, ((0, 0), (0, np_ - n), (0, np_ - n)))
    adj_vs = adj_p.reshape(r * np_, np_).astype(bf16)      # exact 0/1 in bf16
    deg = adj_p.sum(axis=-1)                                # [R, Np]
    inv_deg = jnp.where(deg > 0, 1.0 / jnp.maximum(deg, 1.0), 0.0)
    inv_deg = inv_deg.reshape(r * np_, 1).astype(f32)
    pool_p = jnp.pad(pool, ((0, gp - g), (0, np_ - n))).astype(bf16)

    args = (x_p, adj_vs, inv_deg,
            prepped["w1_root"], prepped["w1_rel"], prepped["b1"],
            prepped["w2_root"], prepped["w2_rel"], prepped["b2"],
            pool_p, prepped["w_lin"], prepped["b_lin"])

    def full(shape):
        return pl.BlockSpec(shape, lambda i, _s=len(shape): (0,) * _s)

    # advisory cost for XLA scheduling around the custom call
    per_layer_flops = (2 * np_ * dp * dp            # root
                       + 2 * r * np_ * np_ * dp     # aggregation
                       + 2 * r * np_ * dp * dp)     # relation weights
    flops = 2 * per_layer_flops + 2 * gp * np_ * dp + 2 * gp * dp * cp
    in_bytes = sum(int(a.size) * a.dtype.itemsize for a in args)
    out_bytes = gp * cp * 4
    cost = pl.CostEstimate(flops=int(flops), transcendentals=0,
                           bytes_accessed=int(in_bytes + out_bytes))

    # raise the scoped-VMEM ceiling only when the (double-buffered) resident
    # set would exceed the smallest default limit (16 MiB on v5e).
    compiler_kwargs = dict(dimension_semantics=("arbitrary",))
    resident = 2 * in_bytes + out_bytes
    if resident > 16 * 2 ** 20:
        compiler_kwargs["vmem_limit_bytes"] = int(min(60 * 2 ** 20,
                                                      resident * 5 // 4))

    # TODO(synk): for graphs with N >> 128, add a node-row grid axis marked
    # "parallel" (v7x has 2 TCs), K-tile the contraction dim with an f32
    # accumulator scratch, mark single-pass inputs pipeline_mode=pl.Buffered(1),
    # and replace the dense [R,N,N] adjacency with a scalar-prefetched sparse
    # gather; at this toy size a single fully-resident block is optimal.
    out = pl.pallas_call(
        _rgcn_fused_kernel,
        out_shape=jax.ShapeDtypeStruct((gp, cp), f32),
        grid=(1,),
        in_specs=[
            full((np_, dp)), full((r * np_, np_)), full((r * np_, 1)),
            full((dp, dp)), full((r * dp, dp)), full((1, dp)),
            full((dp, dp)), full((r * dp, dp)), full((1, dp)),
            full((gp, np_)), full((dp, cp)), full((1, cp)),
        ],
        out_specs=full((gp, cp)),
        compiler_params=pltpu.CompilerParams(**compiler_kwargs),
        cost_estimate=cost,
    )(*args)

    return out[:g, :num_classes]


# ------------------------------ glue (plain JAX) -----------------------------

def build_adj_counts(edge_index, edge_type, num_nodes, num_relations):
    """A[r, dst, src] = number of relation-r edges src -> dst (exact counts)."""
    src, dst = edge_index[0], edge_index[1]
    adj = jnp.zeros((num_relations, num_nodes, num_nodes), jnp.float32)
    return adj.at[edge_type, dst, src].add(1.0)


def build_pool_matrix(batch, num_graphs, num_nodes):
    pool = jnp.zeros((num_graphs, num_nodes), jnp.float32)
    pool = pool.at[batch, jnp.arange(num_nodes)].set(1.0)
    counts = pool.sum(axis=1, keepdims=True)
    return pool / jnp.maximum(counts, 1.0)


def reference_forward_f32(params, x, adj_norm, pool):
    """Pure f32 reference (PyTorch eval-mode semantics, mean aggregation)."""
    def layer(h, w_rel, w_root, b):
        out = h @ w_root + b
        out = out + jnp.einsum("rij,jd,rde->ie", adj_norm, h, w_rel)
        return jnp.maximum(out, 0.0)
    h = layer(x, params["w1_rel"], params["w1_root"], params["b1"])
    h = layer(h, params["w2_rel"], params["w2_root"], params["b2"])
    return pool @ h @ params["w_lin"] + params["b_lin"]


def reference_forward_matched(params, x, adj_counts, pool):
    """Same precision recipe as the kernel: exact 0/1 adjacency, bf16 matmul
    operands, f32 accumulation, f32 inv-degree post-scale."""
    c = lambda a: a.astype(jnp.bfloat16).astype(jnp.float32)
    deg = adj_counts.sum(axis=-1)
    inv_deg = jnp.where(deg > 0, 1.0 / jnp.maximum(deg, 1.0), 0.0)
    adj_b = c(adj_counts)                    # exact (0/1/small ints)

    def layer(h, w_rel, w_root, b):
        hb = c(h)
        root = hb @ c(w_root)
        agg = jnp.einsum("rij,jd->rid", adj_b, hb)
        agg = agg * inv_deg[:, :, None]
        rel = jnp.einsum("rid,rde->ie", c(agg), c(w_rel))
        return jnp.maximum(root + rel + b, 0.0)

    h = layer(x, params["w1_rel"], params["w1_root"], params["b1"])
    h = layer(h, params["w2_rel"], params["w2_root"], params["b2"])
    pooled = c(pool) @ c(h)
    return c(pooled) @ c(params["w_lin"]) + params["b_lin"]


# --------------------------------- main --------------------------------------

if __name__ == "__main__":
    key = jax.random.PRNGKey(0)

    # small, self-consistent synthetic problem
    num_nodes = 16
    in_dim = 8
    hidden_dim = 32
    num_relations = 3
    num_classes = 5
    num_graphs = 2
    num_edges = 40

    keys = jax.random.split(key, 12)

    x = jax.random.normal(keys[0], (num_nodes, in_dim), jnp.float32)
    src = jax.random.randint(keys[1], (num_edges,), 0, num_nodes)
    dst = jax.random.randint(keys[2], (num_edges,), 0, num_nodes)
    edge_index = jnp.stack([src, dst], axis=0)                # [2, E]
    edge_type = jax.random.randint(keys[3], (num_edges,), 0, num_relations)
    batch = jnp.concatenate([
        jnp.zeros(num_nodes // 2, jnp.int32),
        jnp.ones(num_nodes - num_nodes // 2, jnp.int32),
    ])

    def glorot(k, shape):
        fan_in, fan_out = shape[-2], shape[-1]
        lim = (6.0 / (fan_in + fan_out)) ** 0.5
        return jax.random.uniform(k, shape, jnp.float32, -lim, lim)

    params = {
        "w1_rel":  glorot(keys[4], (num_relations, in_dim, hidden_dim)),
        "w1_root": glorot(keys[5], (in_dim, hidden_dim)),
        "b1":      jnp.zeros((1, hidden_dim), jnp.float32),
        "w2_rel":  glorot(keys[6], (num_relations, hidden_dim, hidden_dim)),
        "w2_root": glorot(keys[7], (hidden_dim, hidden_dim)),
        "b2":      jnp.zeros((1, hidden_dim), jnp.float32),
        # torch Linear weight is [C, H]; we store its transpose [H, C]
        "w_lin":   glorot(keys[8], (hidden_dim, num_classes)),
        "b_lin":   jax.random.uniform(keys[9], (1, num_classes), jnp.float32,
                                      -1.0 / hidden_dim ** 0.5,
                                      1.0 / hidden_dim ** 0.5),
    }

    adj_counts = build_adj_counts(edge_index, edge_type, num_nodes,
                                  num_relations)
    pool = build_pool_matrix(batch, num_graphs, num_nodes)

    # one-time weight prep (NOT on the per-call path)
    prepped = prepare_params(params)

    out = rgcn_forward(prepped, num_classes, x, adj_counts, pool)
    out = jax.block_until_ready(out)
    assert out.shape == (num_graphs, num_classes)

    deg = adj_counts.sum(axis=-1, keepdims=True)
    adj_norm = jnp.where(deg > 0, adj_counts / jnp.maximum(deg, 1.0), 0.0)
    with jax.default_matmul_precision("float32"):
        ref_matched = reference_forward_matched(params, x, adj_counts, pool)
        ref_f32 = reference_forward_f32(params, x, adj_norm, pool)

    # kernel math (bf16 operands, f32 accumulate, f32 deg post-scale) must
    # match the matched-precision reference tightly
    assert jnp.allclose(out, ref_matched, atol=2e-3, rtol=2e-3), \
        "mismatch vs matched-precision reference"
    # and stay close to the full-f32 PyTorch-semantics reference
    assert jnp.allclose(out, ref_f32, atol=5e-2, rtol=5e-2), \
        "mismatch vs f32 reference"

    print("KERNEL_OK")
</pallas_src>

<mosaic_0001>
module attributes {stable_mosaic.version = 11 : i64} {
  func.func @_rgcn_fused_kernel(%arg0: i32, %arg1: memref<128x128xbf16, #tpu.memory_space<vmem>>, %arg2: memref<384x128xbf16, #tpu.memory_space<vmem>>, %arg3: memref<384x1xf32, #tpu.memory_space<vmem>>, %arg4: memref<128x128xbf16, #tpu.memory_space<vmem>>, %arg5: memref<384x128xbf16, #tpu.memory_space<vmem>>, %arg6: memref<1x128xf32, #tpu.memory_space<vmem>>, %arg7: memref<128x128xbf16, #tpu.memory_space<vmem>>, %arg8: memref<384x128xbf16, #tpu.memory_space<vmem>>, %arg9: memref<1x128xf32, #tpu.memory_space<vmem>>, %arg10: memref<8x128xbf16, #tpu.memory_space<vmem>>, %arg11: memref<128x128xbf16, #tpu.memory_space<vmem>>, %arg12: memref<1x128xf32, #tpu.memory_space<vmem>>, %arg13: memref<8x128xf32, #tpu.memory_space<vmem>>) attributes {dimension_semantics = [#tpu.dimension_semantics<arbitrary>], iteration_bounds = array<i64: 1>, scalar_prefetch = 0 : i64, scratch_operands = 0 : i64, tpu.core_type = #tpu.core_type<tc>, window_params = [{pipeline_mode = #tpu.pipeline_mode<synchronous>, transform_indices = @transform_0, window_bounds = array<i64: 128, 128>}, {pipeline_mode = #tpu.pipeline_mode<synchronous>, transform_indices = @transform_1, window_bounds = array<i64: 384, 128>}, {pipeline_mode = #tpu.pipeline_mode<synchronous>, transform_indices = @transform_2, window_bounds = array<i64: 384, 1>}, {pipeline_mode = #tpu.pipeline_mode<synchronous>, transform_indices = @transform_3, window_bounds = array<i64: 128, 128>}, {pipeline_mode = #tpu.pipeline_mode<synchronous>, transform_indices = @transform_4, window_bounds = array<i64: 384, 128>}, {pipeline_mode = #tpu.pipeline_mode<synchronous>, transform_indices = @transform_5, window_bounds = array<i64: 1, 128>}, {pipeline_mode = #tpu.pipeline_mode<synchronous>, transform_indices = @transform_6, window_bounds = array<i64: 128, 128>}, {pipeline_mode = #tpu.pipeline_mode<synchronous>, transform_indices = @transform_7, window_bounds = array<i64: 384, 128>}, {pipeline_mode = #tpu.pipeline_mode<synchronous>, transform_indices = @transform_8, window_bounds = array<i64: 1, 128>}, {pipeline_mode = #tpu.pipeline_mode<synchronous>, transform_indices = @transform_9, window_bounds = array<i64: 8, 128>}, {pipeline_mode = #tpu.pipeline_mode<synchronous>, transform_indices = @transform_10, window_bounds = array<i64: 128, 128>}, {pipeline_mode = #tpu.pipeline_mode<synchronous>, transform_indices = @transform_11, window_bounds = array<i64: 1, 128>}, {pipeline_mode = #tpu.pipeline_mode<synchronous>, transform_indices = @transform_12, window_bounds = array<i64: 8, 128>}]} {
    %c0 = arith.constant 0 : index
    %c0_0 = arith.constant 0 : index
    %0 = vector.load %arg1[%c0, %c0_0] : memref<128x128xbf16, #tpu.memory_space<vmem>>, vector<128x128xbf16>
    %c0_1 = arith.constant 0 : index
    %c0_2 = arith.constant 0 : index
    %1 = vector.load %arg4[%c0_1, %c0_2] : memref<128x128xbf16, #tpu.memory_space<vmem>>, vector<128x128xbf16>
    %cst = arith.constant dense<0.000000e+00> : vector<128x128xf32>
    %2 = tpu.matmul %0, %1, %cst {dimension_numbers = #tpu.dot_dimension_numbers<[1], [0], [0], [1], [0, 0, 1, 1], [], []>} : vector<128x128xbf16>, vector<128x128xbf16>, vector<128x128xf32> -> vector<128x128xf32>
    %c0_3 = arith.constant 0 : index
    %c0_4 = arith.constant 0 : index
    %3 = vector.load %arg2[%c0_3, %c0_4] : memref<384x128xbf16, #tpu.memory_space<vmem>>, vector<384x128xbf16>
    %cst_5 = arith.constant dense<0.000000e+00> : vector<384x128xf32>
    %4 = tpu.matmul %3, %0, %cst_5 {dimension_numbers = #tpu.dot_dimension_numbers<[1], [0], [0], [1], [0, 0, 1, 1], [], []>} : vector<384x128xbf16>, vector<128x128xbf16>, vector<384x128xf32> -> vector<384x128xf32>
    %c0_6 = arith.constant 0 : index
    %c0_7 = arith.constant 0 : index
    %5 = vector.load %arg3[%c0_6, %c0_7] : memref<384x1xf32, #tpu.memory_space<vmem>>, vector<384x1xf32>
    %6 = vector.broadcast %5 : vector<384x1xf32> to vector<384x128xf32>
    %7 = arith.mulf %4, %6 : vector<384x128xf32>
    %8 = vector.extract_strided_slice %7 {offsets = [0, 0], sizes = [128, 128], strides = [1, 1]} : vector<384x128xf32> to vector<128x128xf32>
    %9 = arith.truncf %8 : vector<128x128xf32> to vector<128x128xbf16>
    %c0_8 = arith.constant 0 : index
    %c0_9 = arith.constant 0 : index
    %10 = vector.load %arg5[%c0_8, %c0_9] : memref<384x128xbf16, #tpu.memory_space<vmem>>, vector<128x128xbf16>
    %cst_10 = arith.constant dense<0.000000e+00> : vector<128x128xf32>
    %11 = tpu.matmul %9, %10, %cst_10 {dimension_numbers = #tpu.dot_dimension_numbers<[1], [0], [0], [1], [0, 0, 1, 1], [], []>} : vector<128x128xbf16>, vector<128x128xbf16>, vector<128x128xf32> -> vector<128x128xf32>
    %12 = arith.addf %2, %11 : vector<128x128xf32>
    %13 = vector.extract_strided_slice %7 {offsets = [128, 0], sizes = [128, 128], strides = [1, 1]} : vector<384x128xf32> to vector<128x128xf32>
    %14 = arith.truncf %13 : vector<128x128xf32> to vector<128x128xbf16>
    %c128 = arith.constant 128 : index
    %c0_11 = arith.constant 0 : index
    %15 = vector.load %arg5[%c128, %c0_11] : memref<384x128xbf16, #tpu.memory_space<vmem>>, vector<128x128xbf16>
    %cst_12 = arith.constant dense<0.000000e+00> : vector<128x128xf32>
    %16 = tpu.matmul %14, %15, %cst_12 {dimension_numbers = #tpu.dot_dimension_numbers<[1], [0], [0], [1], [0, 0, 1, 1], [], []>} : vector<128x128xbf16>, vector<128x128xbf16>, vector<128x128xf32> -> vector<128x128xf32>
    %17 = arith.addf %12, %16 : vector<128x128xf32>
    %18 = vector.extract_strided_slice %7 {offsets = [256, 0], sizes = [128, 128], strides = [1, 1]} : vector<384x128xf32> to vector<128x128xf32>
    %19 = arith.truncf %18 : vector<128x128xf32> to vector<128x128xbf16>
    %c256 = arith.constant 256 : index
    %c0_13 = arith.constant 0 : index
    %20 = vector.load %arg5[%c256, %c0_13] : memref<384x128xbf16, #tpu.memory_space<vmem>>, vector<128x128xbf16>
    %cst_14 = arith.constant dense<0.000000e+00> : vector<128x128xf32>
    %21 = tpu.matmul %19, %20, %cst_14 {dimension_numbers = #tpu.dot_dimension_numbers<[1], [0], [0], [1], [0, 0, 1, 1], [], []>} : vector<128x128xbf16>, vector<128x128xbf16>, vector<128x128xf32> -> vector<128x128xf32>
    %22 = arith.addf %17, %21 : vector<128x128xf32>
    %c0_15 = arith.constant 0 : index
    %c0_16 = arith.constant 0 : index
    %23 = vector.load %arg6[%c0_15, %c0_16] : memref<1x128xf32, #tpu.memory_space<vmem>>, vector<1x128xf32>
    %24 = vector.broadcast %23 : vector<1x128xf32> to vector<128x128xf32>
    %25 = arith.addf %22, %24 : vector<128x128xf32>
    %cst_17 = arith.constant 0.000000e+00 : f32
    %26 = vector.broadcast %cst_17 : f32 to vector<128x128xf32>
    %27 = arith.maximumf %25, %26 : vector<128x128xf32>
    %28 = arith.truncf %27 : vector<128x128xf32> to vector<128x128xbf16>
    %c0_18 = arith.constant 0 : index
    %c0_19 = arith.constant 0 : index
    %29 = vector.load %arg7[%c0_18, %c0_19] : memref<128x128xbf16, #tpu.memory_space<vmem>>, vector<128x128xbf16>
    %cst_20 = arith.constant dense<0.000000e+00> : vector<128x128xf32>
    %30 = tpu.matmul %28, %29, %cst_20 {dimension_numbers = #tpu.dot_dimension_numbers<[1], [0], [0], [1], [0, 0, 1, 1], [], []>} : vector<128x128xbf16>, vector<128x128xbf16>, vector<128x128xf32> -> vector<128x128xf32>
    %c0_21 = arith.constant 0 : index
    %c0_22 = arith.constant 0 : index
    %31 = vector.load %arg2[%c0_21, %c0_22] : memref<384x128xbf16, #tpu.memory_space<vmem>>, vector<384x128xbf16>
    %cst_23 = arith.constant dense<0.000000e+00> : vector<384x128xf32>
    %32 = tpu.matmul %31, %28, %cst_23 {dimension_numbers = #tpu.dot_dimension_numbers<[1], [0], [0], [1], [0, 0, 1, 1], [], []>} : vector<384x128xbf16>, vector<128x128xbf16>, vector<384x128xf32> -> vector<384x128xf32>
    %c0_24 = arith.constant 0 : index
    %c0_25 = arith.constant 0 : index
    %33 = vector.load %arg3[%c0_24, %c0_25] : memref<384x1xf32, #tpu.memory_space<vmem>>, vector<384x1xf32>
    %34 = vector.broadcast %33 : vector<384x1xf32> to vector<384x128xf32>
    %35 = arith.mulf %32, %34 : vector<384x128xf32>
    %36 = vector.extract_strided_slice %35 {offsets = [0, 0], sizes = [128, 128], strides = [1, 1]} : vector<384x128xf32> to vector<128x128xf32>
    %37 = arith.truncf %36 : vector<128x128xf32> to vector<128x128xbf16>
    %c0_26 = arith.constant 0 : index
    %c0_27 = arith.constant 0 : index
    %38 = vector.load %arg8[%c0_26, %c0_27] : memref<384x128xbf16, #tpu.memory_space<vmem>>, vector<128x128xbf16>
    %cst_28 = arith.constant dense<0.000000e+00> : vector<128x128xf32>
    %39 = tpu.matmul %37, %38, %cst_28 {dimension_numbers = #tpu.dot_dimension_numbers<[1], [0], [0], [1], [0, 0, 1, 1], [], []>} : vector<128x128xbf16>, vector<128x128xbf16>, vector<128x128xf32> -> vector<128x128xf32>
    %40 = arith.addf %30, %39 : vector<128x128xf32>
    %41 = vector.extract_strided_slice %35 {offsets = [128, 0], sizes = [128, 128], strides = [1, 1]} : vector<384x128xf32> to vector<128x128xf32>
    %42 = arith.truncf %41 : vector<128x128xf32> to vector<128x128xbf16>
    %c128_29 = arith.constant 128 : index
    %c0_30 = arith.constant 0 : index
    %43 = vector.load %arg8[%c128_29, %c0_30] : memref<384x128xbf16, #tpu.memory_space<vmem>>, vector<128x128xbf16>
    %cst_31 = arith.constant dense<0.000000e+00> : vector<128x128xf32>
    %44 = tpu.matmul %42, %43, %cst_31 {dimension_numbers = #tpu.dot_dimension_numbers<[1], [0], [0], [1], [0, 0, 1, 1], [], []>} : vector<128x128xbf16>, vector<128x128xbf16>, vector<128x128xf32> -> vector<128x128xf32>
    %45 = arith.addf %40, %44 : vector<128x128xf32>
    %46 = vector.extract_strided_slice %35 {offsets = [256, 0], sizes = [128, 128], strides = [1, 1]} : vector<384x128xf32> to vector<128x128xf32>
    %47 = arith.truncf %46 : vector<128x128xf32> to vector<128x128xbf16>
    %c256_32 = arith.constant 256 : index
    %c0_33 = arith.constant 0 : index
    %48 = vector.load %arg8[%c256_32, %c0_33] : memref<384x128xbf16, #tpu.memory_space<vmem>>, vector<128x128xbf16>
    %cst_34 = arith.constant dense<0.000000e+00> : vector<128x128xf32>
    %49 = tpu.matmul %47, %48, %cst_34 {dimension_numbers = #tpu.dot_dimension_numbers<[1], [0], [0], [1], [0, 0, 1, 1], [], []>} : vector<128x128xbf16>, vector<128x128xbf16>, vector<128x128xf32> -> vector<128x128xf32>
    %50 = arith.addf %45, %49 : vector<128x128xf32>
    %c0_35 = arith.constant 0 : index
    %c0_36 = arith.constant 0 : index
    %51 = vector.load %arg9[%c0_35, %c0_36] : memref<1x128xf32, #tpu.memory_space<vmem>>, vector<1x128xf32>
    %52 = vector.broadcast %51 : vector<1x128xf32> to vector<128x128xf32>
    %53 = arith.addf %50, %52 : vector<128x128xf32>
    %cst_37 = arith.constant 0.000000e+00 : f32
    %54 = vector.broadcast %cst_37 : f32 to vector<128x128xf32>
    %55 = arith.maximumf %53, %54 : vector<128x128xf32>
    %c0_38 = arith.constant 0 : index
    %c0_39 = arith.constant 0 : index
    %56 = vector.load %arg10[%c0_38, %c0_39] : memref<8x128xbf16, #tpu.memory_space<vmem>>, vector<8x128xbf16>
    %57 = arith.truncf %55 : vector<128x128xf32> to vector<128x128xbf16>
    %cst_40 = arith.constant dense<0.000000e+00> : vector<8x128xf32>
    %58 = tpu.matmul %56, %57, %cst_40 {dimension_numbers = #tpu.dot_dimension_numbers<[1], [0], [0], [1], [0, 0, 1, 1], [], []>} : vector<8x128xbf16>, vector<128x128xbf16>, vector<8x128xf32> -> vector<8x128xf32>
    %59 = arith.truncf %58 : vector<8x128xf32> to vector<8x128xbf16>
    %c0_41 = arith.constant 0 : index
    %c0_42 = arith.constant 0 : index
    %60 = vector.load %arg11[%c0_41, %c0_42] : memref<128x128xbf16, #tpu.memory_space<vmem>>, vector<128x128xbf16>
    %cst_43 = arith.constant dense<0.000000e+00> : vector<8x128xf32>
    %61 = tpu.matmul %59, %60, %cst_43 {dimension_numbers = #tpu.dot_dimension_numbers<[1], [0], [0], [1], [0, 0, 1, 1], [], []>} : vector<8x128xbf16>, vector<128x128xbf16>, vector<8x128xf32> -> vector<8x128xf32>
    %c0_44 = arith.constant 0 : index
    %c0_45 = arith.constant 0 : index
    %62 = vector.load %arg12[%c0_44, %c0_45] : memref<1x128xf32, #tpu.memory_space<vmem>>, vector<1x128xf32>
    %63 = vector.broadcast %62 : vector<1x128xf32> to vector<8x128xf32>
    %64 = arith.addf %61, %63 : vector<8x128xf32>
    %c0_46 = arith.constant 0 : index
    %c0_47 = arith.constant 0 : index
    %65 = vector.load %arg13[%c0_46, %c0_47] : memref<8x128xf32, #tpu.memory_space<vmem>>, vector<8x128xf32>
    tpu.vector_store %arg13[%c0_46, %c0_47], %64 {strides = array<i32>} : memref<8x128xf32, #tpu.memory_space<vmem>>, vector<8x128xf32>,
    return
  }
  func.func @transform_0(%arg0: i32) -> (i32, i32) {
    %c0_i32 = arith.constant 0 : i32
    %c0_i32_0 = arith.constant 0 : i32
    %c0_i32_1 = arith.constant 0 : i32
    return %c0_i32, %c0_i32_0 : i32, i32
  }
  func.func @transform_1(%arg0: i32) -> (i32, i32) {
    %c0_i32 = arith.constant 0 : i32
    %c0_i32_0 = arith.constant 0 : i32
    %c0_i32_1 = arith.constant 0 : i32
    return %c0_i32, %c0_i32_0 : i32, i32
  }
  func.func @transform_2(%arg0: i32) -> (i32, i32) {
    %c0_i32 = arith.constant 0 : i32
    %c0_i32_0 = arith.constant 0 : i32
    %c0_i32_1 = arith.constant 0 : i32
    return %c0_i32, %c0_i32_0 : i32, i32
  }
  func.func @transform_3(%arg0: i32) -> (i32, i32) {
    %c0_i32 = arith.constant 0 : i32
    %c0_i32_0 = arith.constant 0 : i32
    %c0_i32_1 = arith.constant 0 : i32
    return %c0_i32, %c0_i32_0 : i32, i32
  }
  func.func @transform_4(%arg0: i32) -> (i32, i32) {
    %c0_i32 = arith.constant 0 : i32
    %c0_i32_0 = arith.constant 0 : i32
    %c0_i32_1 = arith.constant 0 : i32
    return %c0_i32, %c0_i32_0 : i32, i32
  }
  func.func @transform_5(%arg0: i32) -> (i32, i32) {
    %c0_i32 = arith.constant 0 : i32
    %c0_i32_0 = arith.constant 0 : i32
    %c0_i32_1 = arith.constant 0 : i32
    return %c0_i32, %c0_i32_0 : i32, i32
  }
  func.func @transform_6(%arg0: i32) -> (i32, i32) {
    %c0_i32 = arith.constant 0 : i32
    %c0_i32_0 = arith.constant 0 : i32
    %c0_i32_1 = arith.constant 0 : i32
    return %c0_i32, %c0_i32_0 : i32, i32
  }
  func.func @transform_7(%arg0: i32) -> (i32, i32) {
    %c0_i32 = arith.constant 0 : i32
    %c0_i32_0 = arith.constant 0 : i32
    %c0_i32_1 = arith.constant 0 : i32
    return %c0_i32, %c0_i32_0 : i32, i32
  }
  func.func @transform_8(%arg0: i32) -> (i32, i32) {
    %c0_i32 = arith.constant 0 : i32
    %c0_i32_0 = arith.constant 0 : i32
    %c0_i32_1 = arith.constant 0 : i32
    return %c0_i32, %c0_i32_0 : i32, i32
  }
  func.func @transform_9(%arg0: i32) -> (i32, i32) {
    %c0_i32 = arith.constant 0 : i32
    %c0_i32_0 = arith.constant 0 : i32
    %c0_i32_1 = arith.constant 0 : i32
    return %c0_i32, %c0_i32_0 : i32, i32
  }
  func.func @transform_10(%arg0: i32) -> (i32, i32) {
    %c0_i32 = arith.constant 0 : i32
    %c0_i32_0 = arith.constant 0 : i32
    %c0_i32_1 = arith.constant 0 : i32
    return %c0_i32, %c0_i32_0 : i32, i32
  }
  func.func @transform_11(%arg0: i32) -> (i32, i32) {
    %c0_i32 = arith.constant 0 : i32
    %c0_i32_0 = arith.constant 0 : i32
    %c0_i32_1 = arith.constant 0 : i32
    return %c0_i32, %c0_i32_0 : i32, i32
  }
  func.func @transform_12(%arg0: i32) -> (i32, i32) {
    %c0_i32 = arith.constant 0 : i32
    %c0_i32_0 = arith.constant 0 : i32
    %c0_i32_1 = arith.constant 0 : i32
    return %c0_i32, %c0_i32_0 : i32, i32
  }
}

</mosaic_0001>

<bundles_post_ra>
// kernel: tpu_custom_call.1
= control target key start
LH: loop header
LB: loop body
LE: loop exit
PB: predicated region body
PF: predicated region fallthrough
CT: control target
= control target key end

     0   :  { %17 = vsyncpa [#allocation3], 0  ;;  %s4993_s0 = inlined_call_operand.hbm [shape: bf16[128,128], index: 0, kind: input, shape index: {}]   ;;  %s4994_s1 = inlined_call_operand.vmem [shape: bf16[384,128], index: 1, kind: input, shape index: {}]   ;;  %s4995_s2 = inlined_call_operand.vmem [shape: f32[384,1], index: 2, kind: input, shape index: {}]   ;;  %s4996_s3 = inlined_call_operand.hbm [shape: bf16[128,128], index: 3, kind: input, shape index: {}]   ;;  %s4997_s4 = inlined_call_operand.vmem [shape: bf16[384,128], index: 4, kind: input, shape index: {}]   ;;  %s4998_s5 = inlined_call_operand.vmem [shape: f32[1,128], index: 5, kind: input, shape index: {}]   ;;  %s4999_s6 = inlined_call_operand.hbm [shape: bf16[128,128], index: 6, kind: input, shape index: {}]   ;;  %s5000_s7 = inlined_call_operand.hbm [shape: bf16[384,128], index: 7, kind: input, shape index: {}]   ;;  %s5001_s8 = inlined_call_operand.vmem [shape: f32[1,128], index: 8, kind: input, shape index: {}]   ;;  %s5002_s9 = inlined_call_operand.vmem [shape: bf16[8,128], index: 9, kind: input, shape index: {}]   ;;  %s5003_s10 = inlined_call_operand.hbm [shape: bf16[128,128], index: 10, kind: input, shape index: {}]   ;;  %s5004_s11 = inlined_call_operand.vmem [shape: f32[1,128], index: 11, kind: input, shape index: {}]   ;;  %s5005_s12 = inlined_call_operand.hbm [shape: f32[8,128], index: 12, kind: output, shape index: {}]  }
   0x1   :  { %18 = vsyncpa [#allocation6], 0 }
   0x2   :  { %19 = vsyncpa [#allocation9], 0 }
   0x3   :  { %20 = vsyncpa [#allocation4], 0  ;;  %s3975_s21 = smov [#allocation5]   ;;  %s3976_s23 = smov [#allocation8]  }
   0x4   :  { %s42_s22 = sshll.u32 %s3975_s21, 4  ;;  %s70_s24 = sshll.u32 %s3976_s23, 4  ;;  %s43_s22 = int_to_ptr.vmem [resolvable:$true] %s42_s22  ;;  %s4051_s24 = int_to_ptr.vmem [resolvable:$true] %s70_s24 }
   0x5   :  { %s3835_s27 = scalar_lea.hbm %s4996_s3, 1024 }
   0x6   :  { %p3836_p0 = scmp.ne.s32.totalorder %s4996_s3, %s3835_s27  ;;  %p3839_p1 = scmp.lt.u32.totalorder %s3835_s27, %s4996_s3 }
   0x8   :  { %p3841_p2 = pnand %p3839_p1, %p3836_p0 }
   0xa   :  { %3844 = shalt.err (!%p3841_p2)
}
   0xb   :  { %s3845_s14 = scalar_lea.vmem %s43_s22, 1024  ;;  %p3850_p4 = scmp.lt.s32.totalorder %s43_s22, %s43_s22 }
   0xc   :  { %p3846_p3 = scmp.ne.s32.totalorder %s43_s22, %s3845_s14  ;;  %p3851_p5 = scmp.lt.s32.totalorder %s3845_s14, %s3845_s14 }
   0xe   :  { %p3852_p6 = por %p3851_p5, %p3850_p4 }
  0x10   :  { %p3853_p7 = pnand %p3852_p6, %p3846_p3 }
  0x12   :  { %3856 = shalt.err (!%p3853_p7)
}
  0x13   :  { %s3977_s15 = smov 64   ;;  %s3978_s16 = smov 4  }
  0x14   :  { %48 = dma.hbm_to_vmem [thread:$0]  %s4996_s3, 1024, %s43_s22, [#allocation6], %s3977_s15, %s3977_s15, %s3978_s16  }
  0x15   :  { %s3857_s21 = scalar_lea.hbm %s5000_s7, 3072 }
  0x16   :  { %p3858_p8 = scmp.ne.s32.totalorder %s5000_s7, %s3857_s21  ;;  %p3861_p9 = scmp.lt.u32.totalorder %s3857_s21, %s5000_s7 }
  0x18   :  { %p3863_p10 = pnand %p3861_p9, %p3858_p8 }
  0x1a   :  { %3866 = shalt.err (!%p3863_p10)
}
  0x1b   :  { %s3867_s28 = scalar_lea.vmem %s4051_s24, 3072  ;;  %p3872_p12 = scmp.lt.s32.totalorder %s4051_s24, %s4051_s24 }
  0x1c   :  { %p3868_p11 = scmp.ne.s32.totalorder %s4051_s24, %s3867_s28  ;;  %p3873_p13 = scmp.lt.s32.totalorder %s3867_s28, %s3867_s28 }
  0x1e   :  { %p3874_p0 = por %p3873_p13, %p3872_p12 }
  0x20   :  { %p3875_p1 = pnand %p3874_p0, %p3868_p11 }
  0x22   :  { %3878 = shalt.err (!%p3875_p1)
}
  0x23   :  { %76 = dma.hbm_to_vmem [thread:$0]  %s5000_s7, 3072, %s4051_s24, [#allocation9], %s3977_s15, %s3977_s15, %s3978_s16  }
  0x24   :  { %s3979_s29 = smov [#allocation2]   ;;  %s3980_s13 = smov [#allocation7]  }
  0x25   :  { %s26_s30 = sshll.u32 %s3979_s29, 4  ;;  %s58_s14 = sshll.u32 %s3980_s13, 4  ;;  %s27_s30 = int_to_ptr.vmem [resolvable:$true] %s26_s30  ;;  %s4088_s14 = int_to_ptr.vmem [resolvable:$true] %s58_s14 }
  0x26   :  { %s3879_s19 = scalar_lea.hbm %s4993_s0, 1024 }
  0x27   :  { %p3880_p2 = scmp.ne.s32.totalorder %s4993_s0, %s3879_s19  ;;  %p3883_p3 = scmp.lt.u32.totalorder %s3879_s19, %s4993_s0 }
  0x29   :  { %p3885_p4 = pnand %p3883_p3, %p3880_p2 }
  0x2b   :  { %3888 = shalt.err (!%p3885_p4)
}
  0x2c   :  { %s3889_s7 = scalar_lea.vmem %s27_s30, 1024  ;;  %p3894_p6 = scmp.lt.s32.totalorder %s27_s30, %s27_s30 }
  0x2d   :  { %p3890_p5 = scmp.ne.s32.totalorder %s27_s30, %s3889_s7  ;;  %p3895_p7 = scmp.lt.s32.totalorder %s3889_s7, %s3889_s7 }
  0x2f   :  { %p3896_p8 = por %p3895_p7, %p3894_p6 }
  0x31   :  { %p3897_p9 = pnand %p3896_p8, %p3890_p5 }
  0x33   :  { %3900 = shalt.err (!%p3897_p9)
}
  0x34   :  { %32 = dma.hbm_to_vmem [thread:$0]  %s4993_s0, 1024, %s27_s30, [#allocation3], %s3977_s15, %s3977_s15, %s3978_s16  }
  0x35   :  { %s3901_s3 = scalar_lea.hbm %s4999_s6, 1024 }
  0x36   :  { %p3902_p10 = scmp.ne.s32.totalorder %s4999_s6, %s3901_s3  ;;  %p3905_p11 = scmp.lt.u32.totalorder %s3901_s3, %s4999_s6 }
  0x38   :  { %p3907_p12 = pnand %p3905_p11, %p3902_p10 }
  0x3a   :  { %3910 = shalt.err (!%p3907_p12)
}
  0x3b   :  { %s3911_s18 = scalar_lea.vmem %s4088_s14, 1024  ;;  %p3916_p0 = scmp.lt.s32.totalorder %s4088_s14, %s4088_s14 }
  0x3c   :  { %p3912_p13 = scmp.ne.s32.totalorder %s4088_s14, %s3911_s18  ;;  %p3917_p1 = scmp.lt.s32.totalorder %s3911_s18, %s3911_s18 }
  0x3e   :  { %p3918_p2 = por %p3917_p1, %p3916_p0 }
  0x40   :  { %p3919_p3 = pnand %p3918_p2, %p3912_p13 }
  0x42   :  { %3922 = shalt.err (!%p3919_p3)
}
  0x43   :  { %64 = dma.hbm_to_vmem [thread:$0]  %s4999_s6, 1024, %s4088_s14, [#allocation6], %s3977_s15, %s3977_s15, %s3978_s16  }
  0x44   :  { %s3981_s19 = smov [#allocation10]   ;;  %s3923_s25 = scalar_lea.hbm %s5003_s10, 1024 }
  0x45   :  { %s86_s20 = sshll.u32 %s3981_s19, 4  ;;  %p3924_p4 = scmp.ne.s32.totalorder %s5003_s10, %s3923_s25  ;;  %s87_s20 = int_to_ptr.vmem [resolvable:$true] %s86_s20 }
  0x46   :  { %p3927_p5 = scmp.lt.u32.totalorder %s3923_s25, %s5003_s10 }
  0x48   :  { %p3929_p6 = pnand %p3927_p5, %p3924_p4 }
  0x4a   :  { %3932 = shalt.err (!%p3929_p6)
}
  0x4b   :  { %s3933_s28 = scalar_lea.vmem %s87_s20, 1024  ;;  %p3938_p8 = scmp.lt.s32.totalorder %s87_s20, %s87_s20 }
  0x4c   :  { %p3934_p7 = scmp.ne.s32.totalorder %s87_s20, %s3933_s28  ;;  %p3939_p9 = scmp.lt.s32.totalorder %s3933_s28, %s3933_s28 }
  0x4e   :  { %p3940_p10 = por %p3939_p9, %p3938_p8 }
  0x50   :  { %p3941_p11 = pnand %p3940_p10, %p3934_p7 }
  0x52   :  { %3944 = shalt.err (!%p3941_p11)
}
  0x53   :  { %92 = dma.hbm_to_vmem [thread:$0]  %s5003_s10, 1024, %s87_s20, [#allocation9], %s3977_s15, %s3977_s15, %s3978_s16  }
  0x54   :  { %3967 = dma.done.wait [#allocation3], 1024  }
  0x55   :  { %3968 = vsyncadd [#allocation3], 4294966272 }
  0x56   :  { %3969 = dma.done.wait [#allocation6], 2048  }
  0x57   :  { %3970 = vsyncadd [#allocation6], 4294965248 }
  0x58   :  { %3971 = dma.done.wait [#allocation9], 4096  }
  0x59   :  { %3972 = vsyncadd [#allocation9], 4294963200  ;;  %v3982_v0 = vmov 0   ;;  %v4140_v1 = vld [vmem:[#allocation2] sm:$0xff]   ;;  %v3717_v2 = vld [vmem:[#allocation2 + $0x8] sm:$0xff]   ;;  %vm3984_vm0 = vmmov 0  }
  0x5a   :  { %3714 = vset.pattern.permute.xlu0 %v3982_v0  ;;  %3715 = vset.pattern.permute.xlu1 %v3982_v0  ;;  %v4144_v3 = vld [vmem:[#allocation2 + $0x10] sm:$0xff]   ;;  %v608_v4 = vld [vmem:[%s4995_s2] sm:$0xff]  ;;  %v3719_v6 = vld [vmem:[#allocation2 + $0x18] sm:$0xff]   ;;  %s3985_s17 = smov [#allocation11]  }
  0x5b   :  { %3183 = vmatprep.subr.bf16.mxu0 %v4140_v1  ;;  %v610_v5 = vld [vmem:[%s4995_s2 + $0x10] sm:$0xff]  ;;  %658 = vperm.xlu0 %3714, %v608_v4   ;;  %v609_v7 = vld [vmem:[%s4995_s2 + $0x8] sm:$0xff]  ;;  %v611_v8 = vld [vmem:[%s4995_s2 + $0x18] sm:$0xff]  ;;  %s2855_s18 = sshll.u32 %s3985_s17, 4  ;;  %s2856_s18 = int_to_ptr.vmem [resolvable:$true] %s2855_s18 }
  0x5c   :  { %3184 = vmatpush3.bf16.msra.mxu0 %v4140_v1  ;;  %668 = vperm.xlu1 %3715, %v610_v5   ;;  %v4162_v9 = vld [vmem:[%s4994_s1] sm:$0xff]   ;;  %v613_v12 = vld [vmem:[%s4995_s2 + $0x28] sm:$0xff]  ;;  %v614_v14 = vld [vmem:[%s4995_s2 + $0x30] sm:$0xff]  ;;  %s3945_s0 = scalar_lea.vmem %s2856_s18, 128  ;;  %p3950_p13 = scmp.lt.s32.totalorder %s2856_s18, %s2856_s18 }
  0x5d   :  { %3185 = vmatprep.subr.bf16.mxu0 %v3717_v2  ;;  %v4165_v10 = vld [vmem:[#allocation2 + $0x20] sm:$0xff]   ;;  %3199 = vmatprep.mubr.bf16.mxu0 %v4162_v9  ;;  %v3721_v13 = vld [vmem:[#allocation2 + $0x28] sm:$0xff]   ;;  %v615_v15 = vld [vmem:[%s4995_s2 + $0x38] sm:$0xff]  ;;  %p3946_p12 = scmp.ne.s32.totalorder %s2856_s18, %s3945_s0  ;;  %p3951_p0 = scmp.lt.s32.totalorder %s3945_s0, %s3945_s0 }
  0x5e   :  { %v612_v11 = vld [vmem:[%s4995_s2 + $0x20] sm:$0xff]  ;;  %v4182_v16 = vld [vmem:[#allocation2 + $0x30] sm:$0xff]   ;;  %v617_v18 = vld [vmem:[%s4995_s2 + $0x48] sm:$0xff] }
  0x5f   :  { %663 = vperm.xlu0 %3714, %v609_v7   ;;  %v616_v17 = vld [vmem:[%s4995_s2 + $0x40] sm:$0xff]  ;;  %v4190_v19 = vld [vmem:[#allocation2 + $0x38] sm:$0xff]   ;;  %v618_v20 = vld [vmem:[%s4995_s2 + $0x50] sm:$0xff]  ;;  %p3952_p1 = por %p3951_p0, %p3950_p13 }
  0x60   :  { %3186 = vmatpush3.bf16.msra.mxu0 %v3717_v2  ;;  %673 = vperm.xlu1 %3715, %v611_v8   ;;  %v619_v21 = vld [vmem:[%s4995_s2 + $0x58] sm:$0xff]  ;;  %v620_v22 = vld [vmem:[%s4995_s2 + $0x60] sm:$0xff]  ;;  %v621_v23 = vld [vmem:[%s4995_s2 + $0x68] sm:$0xff] }
  0x61   :  { %3187 = vmatprep.subr.bf16.mxu0 %v4144_v3  ;;  %v3725_v24 = vld [vmem:[%s4994_s1 + $0x8] sm:$0xff]   ;;  %v3726_v25 = vld [vmem:[%s4994_s1 + $0x10] sm:$0xff]   ;;  %v623_v27 = vld [vmem:[%s4995_s2 + $0x78] sm:$0xff]  ;;  %p3953_p2 = pnand %p3952_p1, %p3946_p12 }
  0x62   :  { %v622_v26 = vld [vmem:[%s4995_s2 + $0x70] sm:$0xff]  ;;  %v624_v28 = vld [vmem:[%s4995_s2 + $0x80] sm:$0xff]  ;;  %v625_v29 = vld [vmem:[%s4995_s2 + $0x88] sm:$0xff] }
  0x63   :  { %678 = vperm.xlu0 %3714, %v612_v11   ;;  %v3727_v30 = vld [vmem:[%s4994_s1 + $0x18] sm:$0xff]   ;;  %v3728_v31 = vld [vmem:[%s4994_s1 + $0x20] sm:$0xff]   ;;  %v626_v32 = vld [vmem:[%s4995_s2 + $0x90] sm:$0xff] }
  0x64   :  { %3188 = vmatpush3.bf16.msra.mxu0 %v4144_v3  ;;  %683 = vperm.xlu1 %3715, %v613_v12   ;;  %v627_v33 = vld [vmem:[%s4995_s2 + $0x98] sm:$0xff]  ;;  %v628_v34 = vld [vmem:[%s4995_s2 + $0xa0] sm:$0xff]  ;;  %v3729_v35 = vld [vmem:[%s4994_s1 + $0x28] sm:$0xff]  }
  0x65   :  { %3189 = vmatprep.subr.bf16.mxu0 %v3719_v6  ;;  %v3730_v36 = vld [vmem:[%s4994_s1 + $0x30] sm:$0xff]   ;;  %v629_v37 = vld [vmem:[%s4995_s2 + $0xa8] sm:$0xff]  ;;  %v631_v39 = vld [vmem:[%s4995_s2 + $0xb8] sm:$0xff] }
  0x66   :  { %v630_v38 = vld [vmem:[%s4995_s2 + $0xb0] sm:$0xff]  ;;  %v632_v40 = vld [vmem:[%s4995_s2 + $0xc0] sm:$0xff]  ;;  %v633_v41 = vld [vmem:[%s4995_s2 + $0xc8] sm:$0xff] }
  0x67   :  { %688 = vperm.xlu0 %3714, %v614_v14   ;;  %v3731_v42 = vld [vmem:[%s4994_s1 + $0x38] sm:$0xff]   ;;  %v3732_v43 = vld [vmem:[%s4994_s1 + $0x40] sm:$0xff]   ;;  %v634_v44 = vld [vmem:[%s4995_s2 + $0xd0] sm:$0xff] }
  0x68   :  { %3190 = vmatpush3.bf16.msra.mxu0 %v3719_v6  ;;  %693 = vperm.xlu1 %3715, %v615_v15   ;;  %v635_v45 = vld [vmem:[%s4995_s2 + $0xd8] sm:$0xff]  ;;  %v636_v46 = vld [vmem:[%s4995_s2 + $0xe0] sm:$0xff]  ;;  %v637_v47 = vld [vmem:[%s4995_s2 + $0xe8] sm:$0xff] }
  0x69   :  { %3191 = vmatprep.subr.bf16.mxu0 %v4165_v10  ;;  %v3733_v48 = vld [vmem:[%s4994_s1 + $0x48] sm:$0xff]   ;;  %v3734_v49 = vld [vmem:[%s4994_s1 + $0x50] sm:$0xff]   ;;  %v639_v51 = vld [vmem:[%s4995_s2 + $0xf8] sm:$0xff] }
  0x6a   :  { %v638_v50 = vld [vmem:[%s4995_s2 + $0xf0] sm:$0xff]  ;;  %v640_v52 = vld [vmem:[%s4995_s2 + $0x100] sm:$0xff]  ;;  %v641_v53 = vld [vmem:[%s4995_s2 + $0x108] sm:$0xff] }
  0x6b   :  { %698 = vperm.xlu0 %3714, %v616_v17   ;;  %v3735_v54 = vld [vmem:[%s4994_s1 + $0x58] sm:$0xff]   ;;  %v3736_v55 = vld [vmem:[%s4994_s1 + $0x60] sm:$0xff]   ;;  %v642_v56 = vld [vmem:[%s4995_s2 + $0x110] sm:$0xff] }
  0x6c   :  { %3192 = vmatpush3.bf16.msra.mxu0 %v4165_v10  ;;  %703 = vperm.xlu1 %3715, %v617_v18   ;;  %v643_v57 = vld [vmem:[%s4995_s2 + $0x118] sm:$0xff]  ;;  %v644_v58 = vld [vmem:[%s4995_s2 + $0x120] sm:$0xff]  ;;  %v645_v59 = vld [vmem:[%s4995_s2 + $0x128] sm:$0xff] }
  0x6d   :  { %3193 = vmatprep.subr.bf16.mxu0 %v3721_v13  ;;  %v3748_v60 = vld [vmem:[%s4997_s4] sm:$0xff]   ;;  %v4322_v61 = vld [vmem:[%s4994_s1 + $0x68] sm:$0xff]   ;;  %v4327_v62 = vld [vmem:[%s4994_s1 + $0x70] sm:$0xff]  }
  0x6e   :  { %3247 = vmatprep.subr.bf16.mxu1 %v3748_v60  ;;  %v646_v63 = vld [vmem:[%s4995_s2 + $0x130] sm:$0xff]  ;;  %v647_v0 = vld [vmem:[%s4995_s2 + $0x138] sm:$0xff]  ;;  %v3749_v2 = vld [vmem:[%s4997_s4 + $0x8] sm:$0xff]  }
  0x6f   :  { %708 = vperm.xlu0 %3714, %v618_v20   ;;  %3248 = vmatpush3.bf16.msra.mxu1 %v3748_v60  ;;  %v648_v4 = vld [vmem:[%s4995_s2 + $0x140] sm:$0xff]  ;;  %v649_v5 = vld [vmem:[%s4995_s2 + $0x148] sm:$0xff]  ;;  %v3750_v6 = vld [vmem:[%s4997_s4 + $0x10] sm:$0xff]  }
  0x70   :  { %3194 = vmatpush3.bf16.msra.mxu0 %v3721_v13  ;;  %713 = vperm.xlu1 %3715, %v619_v21   ;;  %v4352_v7 = vld [vmem:[%s4994_s1 + $0x78] sm:$0xff]   ;;  %v4357_v8 = vld [vmem:[%s4994_s1 + $0x80] sm:$0xff]   ;;  %v650_v11 = vld [vmem:[%s4995_s2 + $0x150] sm:$0xff] }
  0x71   :  { %3195 = vmatprep.subr.bf16.mxu0 %v4182_v16  ;;  %3249 = vmatprep.subr.bf16.mxu1 %v3749_v2  ;;  %v651_v12 = vld [vmem:[%s4995_s2 + $0x158] sm:$0xff]  ;;  %v652_v14 = vld [vmem:[%s4995_s2 + $0x160] sm:$0xff]  ;;  %v653_v15 = vld [vmem:[%s4995_s2 + $0x168] sm:$0xff] }
  0x72   :  { %v3751_v13 = vld [vmem:[%s4997_s4 + $0x18] sm:$0xff]   ;;  %v3752_v17 = vld [vmem:[%s4997_s4 + $0x20] sm:$0xff]   ;;  %v4382_v18 = vld [vmem:[%s4994_s1 + $0x88] sm:$0xff]  }
  0x73   :  { %718 = vperm.xlu0 %3714, %v620_v22   ;;  %3250 = vmatpush3.bf16.msra.mxu1 %v3749_v2  ;;  %v4387_v20 = vld [vmem:[%s4994_s1 + $0x90] sm:$0xff]   ;;  %v655_v22 = vld [vmem:[%s4995_s2 + $0x178] sm:$0xff] }
  0x74   :  { %3196 = vmatpush3.bf16.msra.mxu0 %v4182_v16  ;;  %723 = vperm.xlu1 %3715, %v621_v23   ;;  %v654_v21 = vld [vmem:[%s4995_s2 + $0x170] sm:$0xff]  ;;  %v3753_v23 = vld [vmem:[%s4997_s4 + $0x28] sm:$0xff]  }
  0x75   :  { %3197 = vmatprep.subr.bf16.mxu0 %v4190_v19  ;;  %3251 = vmatprep.subr.bf16.mxu1 %v3750_v6 }
  0x77   :  { %728 = vperm.xlu0 %3714, %v622_v26   ;;  %3252 = vmatpush3.bf16.msra.mxu1 %v3750_v6  ;;  %v4415_v26 = vld [vmem:[%s4994_s1 + $0xa8] sm:$0xff]  }
  0x78   :  { %3198 = vmatpush3.bf16.msra.mxu0 %v4190_v19  ;;  %733 = vperm.xlu1 %3715, %v623_v27   ;;  %v4420_v27 = vld [vmem:[%s4994_s1 + $0xb0] sm:$0xff]  }
  0x79   :  { %3253 = vmatprep.subr.bf16.mxu1 %v3751_v13 }
  0x7b   :  { %3200 = vmatmul.mubr.bf16.vlgmr.msra.gmra.mrb[0].mxu0 %v3725_v24  ;;  %738 = vperm.xlu0 %3714, %v624_v28   ;;  %v4403_v24 = vld [vmem:[%s4994_s1 + $0x98] sm:$0xff]   ;;  %v3754_v28 = vld [vmem:[%s4997_s4 + $0x30] sm:$0xff]  }
  0x7c   :  { %3203 = vmatprep.mubr.bf16.mxu0 %v3726_v25  ;;  %743 = vperm.xlu1 %3715, %v625_v29   ;;  %v4408_v25 = vld [vmem:[%s4994_s1 + $0xa0] sm:$0xff]   ;;  %v4430_v29 = vld [vmem:[%s4994_s1 + $0xb8] sm:$0xff]  }
  0x7d   :  { %3254 = vmatpush3.bf16.msra.mxu1 %v3751_v13  ;;  %v3758_v13 = vld [vmem:[#allocation5 + $0x10] sm:$0xff]  }
  0x7e   :  { %3255 = vmatprep.subr.bf16.mxu1 %v3752_v17 }
  0x7f   :  { %748 = vperm.xlu0 %3714, %v626_v32  }
  0x80   :  { %753 = vperm.xlu1 %3715, %v627_v33  }
  0x81   :  { %3256 = vmatpush3.bf16.msra.mxu1 %v3752_v17 }
  0x82   :  { %3257 = vmatprep.subr.bf16.mxu1 %v3753_v23 }
  0x83   :  { %3204 = vmatmul.mubr.bf16.gmra.mrb[4].mxu0 %v3727_v30  ;;  %758 = vperm.xlu0 %3714, %v628_v34   ;;  %v3755_v30 = vld [vmem:[%s4997_s4 + $0x38] sm:$0xff]  }
  0x84   :  { %3207 = vmatprep.mubr.bf16.mxu0 %v3728_v31  ;;  %763 = vperm.xlu1 %3715, %v629_v37   ;;  %v3756_v31 = vld [vmem:[#allocation5] sm:$0xff]  }
  0x85   :  { %3258 = vmatpush3.bf16.msra.mxu1 %v3753_v23  ;;  %v3759_v23 = vld [vmem:[#allocation5 + $0x18] sm:$0xff]  }
  0x86   :  { %3259 = vmatprep.subr.bf16.mxu1 %v3754_v28 }
  0x87   :  { %768 = vperm.xlu0 %3714, %v630_v38  }
  0x88   :  { %773 = vperm.xlu1 %3715, %v631_v39  }
  0x89   :  { %3260 = vmatpush3.bf16.msra.mxu1 %v3754_v28 }
  0x8a   :  { %3261 = vmatprep.subr.bf16.mxu1 %v3755_v30 }
  0x8b   :  { %3208 = vmatmul.mubr.bf16.gmra.mrb[8].mxu0 %v3729_v35  ;;  %778 = vperm.xlu0 %3714, %v632_v40  }
  0x8c   :  { %3211 = vmatprep.mubr.bf16.mxu0 %v3730_v36  ;;  %783 = vperm.xlu1 %3715, %v633_v41  }
  0x8d   :  { %3262 = vmatpush3.bf16.msra.mxu1 %v3755_v30 }
  0x8e   :  { %3279 = vmatprep.subr.bf16.mxu1 %v3756_v31 }
  0x8f   :  { %788 = vperm.xlu0 %3714, %v634_v44  }
  0x90   :  { %793 = vperm.xlu1 %3715, %v635_v45  }
  0x93   :  { %3212 = vmatmul.mubr.bf16.gmra.mrb[12].mxu0 %v3731_v42  ;;  %798 = vperm.xlu0 %3714, %v636_v46  }
  0x94   :  { %3215 = vmatprep.mubr.bf16.mxu0 %v3732_v43  ;;  %803 = vperm.xlu1 %3715, %v637_v47  }
  0x97   :  { %808 = vperm.xlu0 %3714, %v638_v50  }
  0x98   :  { %813 = vperm.xlu1 %3715, %v639_v51  }
  0x9b   :  { %3216 = vmatmul.mubr.bf16.gmra.mrb[16].mxu0 %v3733_v48  ;;  %818 = vperm.xlu0 %3714, %v640_v52  }
  0x9c   :  { %3219 = vmatprep.mubr.bf16.mxu0 %v3734_v49  ;;  %823 = vperm.xlu1 %3715, %v641_v53  }
  0x9f   :  { %828 = vperm.xlu0 %3714, %v642_v56  }
  0xa0   :  { %833 = vperm.xlu1 %3715, %v643_v57  }
  0xa3   :  { %3220 = vmatmul.mubr.bf16.gmra.mrb[20].mxu0 %v3735_v54  ;;  %838 = vperm.xlu0 %3714, %v644_v58  }
  0xa4   :  { %3223 = vmatprep.mubr.bf16.mxu0 %v3736_v55  ;;  %843 = vperm.xlu1 %3715, %v645_v59  }
  0xa7   :  { %848 = vperm.xlu0 %3714, %v646_v63   ;;  %v3757_v63 = vld [vmem:[#allocation5 + $0x8] sm:$0xff]  }
  0xa8   :  { %853 = vperm.xlu1 %3715, %v647_v0  }
  0xab   :  { %3224 = vmatmul.mubr.bf16.gmra.mrb[24].mxu0 %v4322_v61  ;;  %858 = vperm.xlu0 %3714, %v648_v4  }
  0xac   :  { %3227 = vmatprep.mubr.bf16.mxu0 %v4327_v62  ;;  %863 = vperm.xlu1 %3715, %v649_v5  }
  0xaf   :  { %868 = vperm.xlu0 %3714, %v650_v11  }
  0xb0   :  { %873 = vperm.xlu1 %3715, %v651_v12  }
  0xb3   :  { %3228 = vmatmul.mubr.bf16.gmra.mrb[28].mxu0 %v4352_v7  ;;  %878 = vperm.xlu0 %3714, %v652_v14  }
  0xb4   :  { %3231 = vmatprep.mubr.bf16.mxu0 %v4357_v8  ;;  %883 = vperm.xlu1 %3715, %v653_v15  }
  0xb7   :  { %888 = vperm.xlu0 %3714, %v654_v21  }
  0xb8   :  { %893 = vperm.xlu1 %3715, %v655_v22  }
  0xbb   :  { %3232 = vmatmul.mubr.bf16.gmra.mrb[32].mxu0 %v4382_v18 }
  0xbc   :  { %3235 = vmatprep.mubr.bf16.mxu0 %v4387_v20 }
  0xc3   :  { %3236 = vmatmul.mubr.bf16.gmra.mrb[36].mxu0 %v4403_v24 }
  0xc4   :  { %3239 = vmatprep.mubr.bf16.mxu0 %v4408_v25 }
  0xcb   :  { %3240 = vmatmul.mubr.bf16.gmra.mrb[40].mxu0 %v4415_v26 }
  0xcc   :  { %3243 = vmatprep.mubr.bf16.mxu0 %v4420_v27 }
  0xd3   :  { %3244 = vmatmul.mubr.bf16.gmra.mrb[44].mxu0 %v4430_v29 }
  0xd4   :  { %3391 = vmatprep.mubr.bf16.mxu0 %v4162_v9 }
  0xda   :  { %v4437_v32 = vpop.permute.xlu0 %658 }
  0xdb   :  { %v4439_v33 = vpop.permute.xlu1 %668 }
  0xde   :  { %v4441_v34 = vpop.permute.xlu0 %663 }
  0xdf   :  { %v4443_v35 = vpop.permute.xlu1 %673 }
  0xe2   :  { %v4445_v36 = vpop.permute.xlu0 %678 }
  0xe3   :  { %v4447_v37 = vpop.permute.xlu1 %683 }
  0xe6   :  { %v4449_v38 = vpop.permute.xlu0 %688 }
  0xe7   :  { %v4451_v39 = vpop.permute.xlu1 %693 }
  0xea   :  { %v4453_v40 = vpop.permute.xlu0 %698 }
  0xeb   :  { %v4455_v9 = vpop.permute.xlu1 %703 }
  0xee   :  { %v4457_v41 = vpop.permute.xlu0 %708 }
  0xef   :  { %v4459_v42 = vpop.permute.xlu1 %713 }
  0xf2   :  { %v4461_v43 = vpop.permute.xlu0 %718 }
  0xf3   :  { %v4463_v44 = vpop.permute.xlu1 %723 }
  0xf6   :  { %v4465_v45 = vpop.permute.xlu0 %728 }
  0xf7   :  { %v4467_v46 = vpop.permute.xlu1 %733 }
  0xfa   :  { %v4469_v47 = vpop.permute.xlu0 %738 }
  0xfb   :  { %5027 = vst [vmem:[#allocation16_spill] sm:$0xff] %v4469_v47  ;;  %v4471_v48 = vpop.permute.xlu1 %743 }
  0xfc   :  { %5028 = vst [vmem:[#allocation17_spill] sm:$0xff] %v4471_v48 }
  0xfe   :  { %v4477_v57 = vpop.permute.xlu0 %748 }
  0xff   :  { %v4479_v59 = vpop.permute.xlu1 %753 }
 0x100   :  { %5029 = vst [vmem:[#allocation18_spill] sm:$0xff] %v4479_v59 }
 0x102   :  { %v4481_v5 = vpop.permute.xlu0 %758 }
 0x103   :  { %5030 = vst [vmem:[#allocation19_spill] sm:$0xff] %v4481_v5  ;;  %v4485_v14 = vpop.permute.xlu1 %763 }
 0x104   :  { %5031 = vst [vmem:[#allocation20_spill] sm:$0xff] %v4485_v14 }
 0x106   :  { %v4489_v30 = vpop.permute.xlu0 %768 }
 0x107   :  { %5032 = vst [vmem:[#allocation21_spill] sm:$0xff] %v4489_v30 }
 0x14e   :  { %v3201_v49 = vpop.f32.mrb[0].mxu0 }
 0x14f   :  { %v417_v50 = vpop.f32.mrb[1].mxu0  ;;  %v898_v52 = vmul.f32 %v3201_v49, %v4439_v33  ;;  %v4491_v49 = vpop.permute.xlu1 %773 }
 0x150   :  { %v3202_v51 = vpop.f32.mrb[2].mxu0  ;;  %v896_v55 = vmul.f32 %v4437_v32, %v417_v50  ;;  %5033 = vst [vmem:[#allocation22_spill] sm:$0xff] %v4491_v49 }
 0x151   :  { %v899_v53 = vmul.f32 %v3202_v51, %v4443_v35  ;;  %v420_v54 = vpop.f32.mrb[3].mxu0 }
 0x152   :  { %v897_v56 = vmul.f32 %v4441_v34, %v420_v54  ;;  %v3760_v54 = vld [vmem:[#allocation5 + $0x20] sm:$0xff]  }
 0x153   :  { %v945_v58 = vpack.c.bf16 %v899_v53, %v898_v52 }
 0x154   :  { %v944_v60 = vpack.c.bf16 %v897_v56, %v896_v55 }
 0x156   :  { %v3205_v0 = vpop.f32.mrb[4].mxu0  ;;  %3263 = vmatprep.mubr.bf16.mxu1 %v944_v60 }
 0x157   :  { %v433_v2 = vpop.f32.mrb[5].mxu0  ;;  %3264 = vmatmul.mubr.bf16.vlgmr.msra.gmra.mrb[0].mxu1 %v945_v58  ;;  %v902_v6 = vmul.f32 %v3205_v0, %v4449_v38  ;;  %v3761_v0 = vld [vmem:[#allocation5 + $0x28] sm:$0xff]  }
 0x158   :  { %v3206_v4 = vpop.f32.mrb[6].mxu0  ;;  %3280 = vmatpush3.bf16.msra.mxu1 %v3756_v31  ;;  %v900_v15 = vmul.f32 %v4445_v36, %v433_v2  ;;  %v4499_v2 = vpop.permute.xlu1 %783 }
 0x159   :  { %v903_v11 = vmul.f32 %v3206_v4, %v4451_v39  ;;  %v436_v12 = vpop.f32.mrb[7].mxu0  ;;  %3281 = vmatprep.subr.bf16.mxu1 %v3757_v63  ;;  %5035 = vst [vmem:[#allocation24_spill] sm:$0xff] %v4499_v2 }
 0x15a   :  { %v901_v17 = vmul.f32 %v4447_v37, %v436_v12 }
 0x15b   :  { %v947_v21 = vpack.c.bf16 %v903_v11, %v902_v6 }
 0x15c   :  { %v946_v22 = vpack.c.bf16 %v901_v17, %v900_v15  ;;  %3282 = vmatpush3.bf16.msra.mxu1 %v3757_v63  ;;  %v4497_v63 = vpop.permute.xlu0 %778  ;;  %v3762_v17 = vld [vmem:[#allocation5 + $0x30] sm:$0xff]  }
 0x15d   :  { %3283 = vmatprep.subr.bf16.mxu1 %v3758_v13  ;;  %5034 = vst [vmem:[#allocation23_spill] sm:$0xff] %v4497_v63 }
 0x15e   :  { %v3209_v28 = vpop.f32.mrb[8].mxu0  ;;  %3267 = vmatprep.mubr.bf16.mxu1 %v946_v22 }
 0x15f   :  { %v449_v31 = vpop.f32.mrb[9].mxu0  ;;  %3268 = vmatmul.mubr.bf16.gmra.mrb[4].mxu1 %v947_v21  ;;  %v906_v51 = vmul.f32 %v3209_v28, %v4457_v41 }
 0x160   :  { %v3210_v50 = vpop.f32.mrb[10].mxu0  ;;  %3284 = vmatpush3.bf16.msra.mxu1 %v3758_v13  ;;  %v904_v55 = vmul.f32 %v4453_v40, %v449_v31  ;;  %v4507_v31 = vpop.permute.xlu1 %793 }
 0x161   :  { %v907_v52 = vmul.f32 %v3210_v50, %v4459_v42  ;;  %v452_v53 = vpop.f32.mrb[11].mxu0  ;;  %3285 = vmatprep.subr.bf16.mxu1 %v3759_v23  ;;  %5037 = vst [vmem:[#allocation26_spill] sm:$0xff] %v4507_v31 }
 0x162   :  { %v905_v56 = vmul.f32 %v4455_v9, %v452_v53 }
 0x163   :  { %v949_v58 = vpack.c.bf16 %v907_v52, %v906_v51  ;;  %v3763_v51 = vld [vmem:[#allocation5 + $0x38] sm:$0xff]  }
 0x164   :  { %v948_v60 = vpack.c.bf16 %v905_v56, %v904_v55  ;;  %3286 = vmatpush3.bf16.msra.mxu1 %v3759_v23  ;;  %v4505_v23 = vpop.permute.xlu0 %788 }
 0x165   :  { %3287 = vmatprep.subr.bf16.mxu1 %v3760_v54  ;;  %5036 = vst [vmem:[#allocation25_spill] sm:$0xff] %v4505_v23 }
 0x166   :  { %v3213_v4 = vpop.f32.mrb[12].mxu0  ;;  %3271 = vmatprep.mubr.bf16.mxu1 %v948_v60 }
 0x167   :  { %v465_v6 = vpop.f32.mrb[13].mxu0  ;;  %3272 = vmatmul.mubr.bf16.gmra.mrb[8].mxu1 %v949_v58  ;;  %v910_v12 = vmul.f32 %v3213_v4, %v4465_v45  ;;  %v4521_v4 = vpop.permute.xlu1 %803 }
 0x168   :  { %v3214_v11 = vpop.f32.mrb[14].mxu0  ;;  %3288 = vmatpush3.bf16.msra.mxu1 %v3760_v54  ;;  %v908_v21 = vmul.f32 %v4461_v43, %v465_v6  ;;  %v4510_v55 = vpop.permute.xlu0 %798  ;;  %5039 = vst [vmem:[#allocation28_spill] sm:$0xff] %v4521_v4 }
 0x169   :  { %v911_v13 = vmul.f32 %v3214_v11, %v4467_v46  ;;  %v468_v15 = vpop.f32.mrb[15].mxu0  ;;  %3289 = vmatprep.subr.bf16.mxu1 %v3761_v0  ;;  %5038 = vst [vmem:[#allocation27_spill] sm:$0xff] %v4510_v55 }
 0x16a   :  { %v909_v22 = vmul.f32 %v4463_v44, %v468_v15 }
 0x16b   :  { %v951_v28 = vpack.c.bf16 %v911_v13, %v910_v12  ;;  %v3765_v13 = vld [vmem:[%s4997_s4 + $0x48] sm:$0xff]  }
 0x16c   :  { %v950_v50 = vpack.c.bf16 %v909_v22, %v908_v21  ;;  %3290 = vmatpush3.bf16.msra.mxu1 %v3761_v0  ;;  %v3764_v0 = vld [vmem:[%s4997_s4 + $0x40] sm:$0xff]   ;;  %v3820_v22 = vld [vmem:[#allocation2 + $0x8] sm:$0xff]  }
 0x16d   :  { %3291 = vmatprep.subr.bf16.mxu1 %v3762_v17 }
 0x16e   :  { %v3217_v52 = vpop.f32.mrb[16].mxu0  ;;  %3275 = vmatprep.mubr.bf16.mxu1 %v950_v50 }
 0x16f   :  { %v481_v53 = vpop.f32.mrb[17].mxu0  ;;  %3276 = vmatmul.mubr.bf16.gmra.mrb[12].mxu1 %v951_v28  ;;  %v4513_v56 = vmul.f32 %v3217_v52, %v4477_v57  ;;  %v4538_v28 = vpop.permute.xlu1 %813 }
 0x170   :  { %v3218_v54 = vpop.f32.mrb[18].mxu0  ;;  %3292 = vmatpush3.bf16.msra.mxu1 %v3762_v17  ;;  %3295 = vmatprep.mubr.bf16.mxu1 %v4140_v1  ;;  %v4524_v6 = vmul.f32 %v4469_v47, %v481_v53  ;;  %v4536_v17 = vpop.permute.xlu0 %808  ;;  %5041 = vst [vmem:[#allocation30_spill] sm:$0xff] %v4538_v28 }
 0x171   :  { %v4516_v58 = vmul.f32 %v3218_v54, %v4479_v59  ;;  %v484_v60 = vpop.f32.mrb[19].mxu0  ;;  %3293 = vmatprep.subr.bf16.mxu1 %v3763_v51  ;;  %5040 = vst [vmem:[#allocation29_spill] sm:$0xff] %v4536_v17  ;;  %v3766_v54 = vld [vmem:[%s4997_s4 + $0x50] sm:$0xff]  }
 0x172   :  { %v4527_v1 = vmul.f32 %v4471_v48, %v484_v60 }
 0x173   :  { %v4565_v11 = vpop.permute.xlu1 %823 }
 0x174   :  { %3294 = vmatpush3.bf16.msra.mxu1 %v3763_v51  ;;  %5043 = vst [vmem:[#allocation32_spill] sm:$0xff] %v4565_v11 }
 0x175   :  { %3311 = vmatprep.subr.bf16.mxu1 %v3764_v0 }
 0x176   :  { %v3221_v15 = vpop.f32.mrb[20].mxu0 }
 0x177   :  { %v497_v21 = vpop.f32.mrb[21].mxu0  ;;  %3296 = vmatmul.mubr.bf16.vlgmr.msra.gmra.mrb[0].mxu1 %v3820_v22  ;;  %v4542_v52 = vmul.f32 %v3221_v15, %v4489_v30  ;;  %v4560_v15 = vpop.permute.xlu0 %818  ;;  %v3770_v30 = vld [vmem:[%s4997_s4 + $0x70] sm:$0xff]  }
 0x178   :  { %v3222_v50 = vpop.f32.mrb[22].mxu0  ;;  %3312 = vmatpush3.bf16.msra.mxu1 %v3764_v0  ;;  %3299 = vmatprep.mubr.bf16.mxu1 %v4144_v3  ;;  %v4551_v60 = vmul.f32 %v4481_v5, %v497_v21  ;;  %5042 = vst [vmem:[#allocation31_spill] sm:$0xff] %v4560_v15  ;;  %v3768_v5 = vld [vmem:[%s4997_s4 + $0x60] sm:$0xff]  }
 0x179   :  { %v4545_v51 = vmul.f32 %v3222_v50, %v4491_v49  ;;  %v500_v53 = vpop.f32.mrb[23].mxu0  ;;  %3313 = vmatprep.subr.bf16.mxu1 %v3765_v13  ;;  %v3767_v50 = vld [vmem:[%s4997_s4 + $0x58] sm:$0xff]  }
 0x17a   :  { %v4554_v22 = vmul.f32 %v4485_v14, %v500_v53  ;;  %v3821_v53 = vld [vmem:[#allocation2 + $0x18] sm:$0xff]  }
 0x17c   :  { %3314 = vmatpush3.bf16.msra.mxu1 %v3765_v13 }
 0x17d   :  { %3315 = vmatprep.subr.bf16.mxu1 %v3766_v54 }
 0x17e   :  { %v3225_v21 = vpop.f32.mrb[24].mxu0 }
 0x17f   :  { %v513_v12 = vpop.f32.mrb[25].mxu0  ;;  %3300 = vmatmul.mubr.bf16.gmra.mrb[4].mxu1 %v3821_v53  ;;  %v4569_v3 = vmul.f32 %v3225_v21, %v4505_v23  ;;  %v4587_v21 = vpop.permute.xlu1 %833 }
 0x180   :  { %v3226_v14 = vpop.f32.mrb[26].mxu0  ;;  %3316 = vmatpush3.bf16.msra.mxu1 %v3766_v54  ;;  %3303 = vmatprep.mubr.bf16.mxu1 %v4165_v10  ;;  %v4578_v49 = vmul.f32 %v4497_v63, %v513_v12  ;;  %v4583_v54 = vpop.permute.xlu0 %828  ;;  %5045 = vst [vmem:[#allocation34_spill] sm:$0xff] %v4587_v21  ;;  %v3769_v12 = vld [vmem:[%s4997_s4 + $0x68] sm:$0xff]  }
 0x181   :  { %v4572_v13 = vmul.f32 %v3226_v14, %v4507_v31  ;;  %v516_v0 = vpop.f32.mrb[27].mxu0  ;;  %3317 = vmatprep.subr.bf16.mxu1 %v3767_v50  ;;  %5044 = vst [vmem:[#allocation33_spill] sm:$0xff] %v4583_v54 }
 0x182   :  { %v4581_v53 = vmul.f32 %v4499_v2, %v516_v0  ;;  %v3822_v0 = vld [vmem:[#allocation2 + $0x28] sm:$0xff]  }
 0x183   :  { %v4606_v48 = vpop.permute.xlu1 %843 }
 0x184   :  { %3318 = vmatpush3.bf16.msra.mxu1 %v3767_v50  ;;  %v4595_v10 = vpop.permute.xlu0 %838 }
 0x185   :  { %3319 = vmatprep.subr.bf16.mxu1 %v3768_v5 }
 0x186   :  { %v3229_v63 = vpop.f32.mrb[28].mxu0 }
 0x187   :  { %v529_v31 = vpop.f32.mrb[29].mxu0  ;;  %3304 = vmatmul.mubr.bf16.gmra.mrb[8].mxu1 %v3822_v0  ;;  %v4598_v23 = vmul.f32 %v3229_v63, %v4536_v17  ;;  %v3771_v0 = vld [vmem:[%s4997_s4 + $0x78] sm:$0xff]   ;;  %v5046_v63 = vpack.c.bf16 %v4527_v1, %v4524_v6  ;;  %v5048_v1 = vpack.c.bf16 %v4554_v22, %v4551_v60 }
 0x188   :  { %v3230_v2 = vpop.f32.mrb[30].mxu0  ;;  %3320 = vmatpush3.bf16.msra.mxu1 %v3768_v5  ;;  %3307 = vmatprep.mubr.bf16.mxu1 %v4182_v16  ;;  %v4609_v5 = vmul.f32 %v4510_v55, %v529_v31  ;;  %v4621_v17 = vpop.permute.xlu0 %848 }
 0x189   :  { %v4601_v50 = vmul.f32 %v3230_v2, %v4538_v28  ;;  %v532_v14 = vpop.f32.mrb[31].mxu0  ;;  %3321 = vmatprep.subr.bf16.mxu1 %v3769_v12 }
 0x18a   :  { %v4612_v16 = vmul.f32 %v4521_v4, %v532_v14  ;;  %v4624_v14 = vpop.permute.xlu1 %853 }
 0x18c   :  { %3322 = vmatpush3.bf16.msra.mxu1 %v3769_v12 }
 0x18d   :  { %3323 = vmatprep.subr.bf16.mxu1 %v3770_v30 }
 0x18e   :  { %v3233_v28 = vpop.f32.mrb[32].mxu0 }
 0x18f   :  { %v545_v31 = vpop.f32.mrb[33].mxu0  ;;  %3308 = vmatmul.mubr.bf16.gmra.mrb[12].mxu1 %v4190_v19  ;;  %v4630_v12 = vmul.f32 %v3233_v28, %v4583_v54  ;;  %v3772_v19 = vld [vmem:[%s4997_s4 + $0x80] sm:$0xff]   ;;  %v3773_v28 = vld [vmem:[%s4997_s4 + $0x88] sm:$0xff]   ;;  %v3774_v54 = vld [vmem:[%s4997_s4 + $0x90] sm:$0xff]  }
 0x190   :  { %v3234_v4 = vpop.f32.mrb[34].mxu0  ;;  %3324 = vmatpush3.bf16.msra.mxu1 %v3770_v30  ;;  %3327 = vmatprep.mubr.bf16.mxu1 %v5046_v63  ;;  %v4639_v47 = vmul.f32 %v4560_v15, %v545_v31  ;;  %v4653_v63 = vpop.permute.xlu1 %863 }
 0x191   :  { %v4633_v2 = vmul.f32 %v3234_v4, %v4587_v21  ;;  %v548_v55 = vpop.f32.mrb[35].mxu0  ;;  %3325 = vmatprep.subr.bf16.mxu1 %v3771_v0  ;;  %v4648_v4 = vpop.permute.xlu0 %858 }
 0x192   :  { %v4642_v30 = vmul.f32 %v4565_v11, %v548_v55  ;;  %v5047_v55 = vpack.c.bf16 %v4516_v58, %v4513_v56 }
 0x194   :  { %3326 = vmatpush3.bf16.msra.mxu1 %v3771_v0  ;;  %v4670_v60 = vpop.permute.xlu1 %873 }
 0x195   :  { %3343 = vmatprep.subr.bf16.mxu1 %v3772_v19  ;;  %v4668_v58 = vpop.permute.xlu0 %868  ;;  %5050 = vst [vmem:[#allocation36_spill] sm:$0xff] %v4670_v60 }
 0x196   :  { %v3237_v31 = vpop.f32.mrb[36].mxu0  ;;  %5049 = vst [vmem:[#allocation35_spill] sm:$0xff] %v4668_v58 }
 0x197   :  { %v561_v15 = vpop.f32.mrb[37].mxu0  ;;  %3328 = vmatmul.mubr.bf16.vlgmr.msra.gmra.mrb[0].mxu1 %v5047_v55  ;;  %v934_v0 = vmul.f32 %v3237_v31, %v4621_v17  ;;  %v5051_v31 = vpack.c.bf16 %v4545_v51, %v4542_v52 }
 0x198   :  { %v3238_v6 = vpop.f32.mrb[38].mxu0  ;;  %3331 = vmatprep.mubr.bf16.mxu1 %v5048_v1  ;;  %3344 = vmatpush3.bf16.msra.mxu1 %v3772_v19  ;;  %v932_v59 = vmul.f32 %v4595_v10, %v561_v15  ;;  %v3775_v19 = vld [vmem:[%s4997_s4 + $0x98] sm:$0xff]   ;;  %v4688_v52 = vpop.permute.xlu1 %883 }
 0x199   :  { %v935_v11 = vmul.f32 %v3238_v6, %v4624_v14  ;;  %v564_v21 = vpop.f32.mrb[39].mxu0  ;;  %3345 = vmatprep.subr.bf16.mxu1 %v3773_v28 }
 0x19a   :  { %v933_v56 = vmul.f32 %v4606_v48, %v564_v21  ;;  %v5052_v21 = vpack.c.bf16 %v4581_v53, %v4578_v49 }
 0x19b   :  { %v1446_v55 = vpack.c.bf16 %v935_v11, %v934_v0  ;;  %v4681_v11 = vpop.permute.xlu0 %878 }
 0x19c   :  { %v1445_v22 = vpack.c.bf16 %v933_v56, %v932_v59  ;;  %3346 = vmatpush3.bf16.msra.mxu1 %v3773_v28  ;;  %v3776_v56 = vld [vmem:[%s4997_s4 + $0xa0] sm:$0xff]  }
 0x19d   :  { %3347 = vmatprep.subr.bf16.mxu1 %v3774_v54 }
 0x19e   :  { %v3241_v6 = vpop.f32.mrb[40].mxu0 }
 0x19f   :  { %v577_v1 = vpop.f32.mrb[41].mxu0  ;;  %3332 = vmatmul.mubr.bf16.gmra.mrb[4].mxu1 %v5051_v31  ;;  %v938_v59 = vmul.f32 %v3241_v6, %v4668_v58  ;;  %v3777_v6 = vld [vmem:[%s4997_s4 + $0xa8] sm:$0xff]   ;;  %v4700_v58 = vpop.permute.xlu1 %893 }
 0x1a0   :  { %v3242_v15 = vpop.f32.mrb[42].mxu0  ;;  %3335 = vmatprep.mubr.bf16.mxu1 %v5052_v21  ;;  %3348 = vmatpush3.bf16.msra.mxu1 %v3774_v54  ;;  %v936_v51 = vmul.f32 %v4648_v4, %v577_v1 }
 0x1a1   :  { %v939_v28 = vmul.f32 %v3242_v15, %v4670_v60  ;;  %v580_v0 = vpop.f32.mrb[43].mxu0  ;;  %3349 = vmatprep.subr.bf16.mxu1 %v3775_v19  ;;  %v4695_v15 = vpop.permute.xlu0 %888  ;;  %v5053_v60 = vpack.c.bf16 %v4572_v13, %v4569_v3 }
 0x1a2   :  { %v937_v49 = vmul.f32 %v4653_v63, %v580_v0 }
 0x1a3   :  { %v1448_v53 = vpack.c.bf16 %v939_v28, %v938_v59  ;;  %v5054_v59 = vpack.c.bf16 %v4612_v16, %v4609_v5  ;;  %v3779_v5 = vld [vmem:[%s4997_s4 + $0xb8] sm:$0xff]   ;;  %v5055_v16 = vpack.c.bf16 %v4601_v50, %v4598_v23  ;;  %v4727_v23 = vld [vmem:[%s4998_s5] ss:$0 sm:$0xff] }
 0x1a4   :  { %v1447_v54 = vpack.c.bf16 %v937_v49, %v936_v51  ;;  %3350 = vmatpush3.bf16.msra.mxu1 %v3775_v19  ;;  %v3778_v51 = vld [vmem:[%s4997_s4 + $0xb0] sm:$0xff]  }
 0x1a5   :  { %3351 = vmatprep.subr.bf16.mxu1 %v3776_v56 }
 0x1a6   :  { %v3245_v31 = vpop.f32.mrb[44].mxu0 }
 0x1a7   :  { %v593_v21 = vpop.f32.mrb[45].mxu0  ;;  %3336 = vmatmul.mubr.bf16.gmra.mrb[8].mxu1 %v5053_v60  ;;  %v942_v19 = vmul.f32 %v3245_v31, %v4695_v15  ;;  %v5057_v31 = vpack.c.bf16 %v4633_v2, %v4630_v12  ;;  %v3780_v2 = vld [vmem:[#allocation8] sm:$0xff]   ;;  %v3781_v12 = vld [vmem:[#allocation8 + $0x8] sm:$0xff]  }
 0x1a8   :  { %v3246_v1 = vpop.f32.mrb[46].mxu0  ;;  %3339 = vmatprep.mubr.bf16.mxu1 %v5054_v59  ;;  %3352 = vmatpush3.bf16.msra.mxu1 %v3776_v56  ;;  %v940_v3 = vmul.f32 %v4681_v11, %v593_v21  ;;  %v5056_v56 = vpack.c.bf16 %v4642_v30, %v4639_v47 }
 0x1a9   :  { %v943_v28 = vmul.f32 %v3246_v1, %v4700_v58  ;;  %v596_v0 = vpop.f32.mrb[47].mxu0  ;;  %3353 = vmatprep.subr.bf16.mxu1 %v3777_v6 }
 0x1aa   :  { %v941_v13 = vmul.f32 %v4688_v52, %v596_v0 }
 0x1ab   :  { %v1450_v60 = vpack.c.bf16 %v943_v28, %v942_v19  ;;  %v3782_v28 = vld [vmem:[#allocation8 + $0x10] sm:$0xff]  }
 0x1ac   :  { %v1449_v49 = vpack.c.bf16 %v941_v13, %v940_v3  ;;  %3354 = vmatpush3.bf16.msra.mxu1 %v3777_v6 }
 0x1ad   :  { %3355 = vmatprep.subr.bf16.mxu1 %v3778_v51 }
 0x1af   :  { %3340 = vmatmul.mubr.bf16.gmra.mrb[12].mxu1 %v5055_v16  ;;  %v3783_v16 = vld [vmem:[#allocation8 + $0x18] sm:$0xff]  }
 0x1b0   :  { %3356 = vmatpush3.bf16.msra.mxu1 %v3778_v51  ;;  %3359 = vmatprep.mubr.bf16.mxu1 %v5056_v56 }
 0x1b1   :  { %3357 = vmatprep.subr.bf16.mxu1 %v3779_v5 }
 0x1b4   :  { %3358 = vmatpush3.bf16.msra.mxu1 %v3779_v5 }
 0x1b5   :  { %3439 = vmatprep.subr.bf16.mxu1 %v3780_v2 }
 0x1b7   :  { %3360 = vmatmul.mubr.bf16.vlgmr.msra.gmra.mrb[0].mxu1 %v5057_v31 }
 0x1b8   :  { %3363 = vmatprep.mubr.bf16.mxu1 %v1445_v22  ;;  %3440 = vmatpush3.bf16.msra.mxu1 %v3780_v2  ;;  %v3784_v2 = vld [vmem:[#allocation8 + $0x20] sm:$0xff]  }
 0x1b9   :  { %3441 = vmatprep.subr.bf16.mxu1 %v3781_v12 }
 0x1bc   :  { %3442 = vmatpush3.bf16.msra.mxu1 %v3781_v12 }
 0x1bd   :  { %3443 = vmatprep.subr.bf16.mxu1 %v3782_v28 }
 0x1bf   :  { %3364 = vmatmul.mubr.bf16.gmra.mrb[4].mxu1 %v1446_v55 }
 0x1c0   :  { %3367 = vmatprep.mubr.bf16.mxu1 %v1447_v54  ;;  %3444 = vmatpush3.bf16.msra.mxu1 %v3782_v28 }
 0x1c1   :  { %3445 = vmatprep.subr.bf16.mxu1 %v3783_v16 }
 0x1c4   :  { %3446 = vmatpush3.bf16.msra.mxu1 %v3783_v16 }
 0x1c5   :  { %3447 = vmatprep.subr.bf16.mxu1 %v3784_v2 }
 0x1c7   :  { %3368 = vmatmul.mubr.bf16.gmra.mrb[8].mxu1 %v1448_v53 }
 0x1c8   :  { %3371 = vmatprep.mubr.bf16.mxu1 %v1449_v49  ;;  %3448 = vmatpush3.bf16.msra.mxu1 %v3784_v2 }
 0x1cf   :  { %3372 = vmatmul.mubr.bf16.gmra.mrb[12].mxu1 %v1450_v60 }
 0x28a   :  { %v3361_v50 = vpop.f32.mrb[0].mxu1 }
 0x28b   :  { %v1637_v47 = vadd.f32 %v3361_v50, %v4727_v23  ;;  %v1549_v30 = vpop.f32.mrb[1].mxu1 }
 0x28c   :  { %v1635_v6 = vadd.f32 %v4727_v23, %v1549_v30  ;;  %v3362_v21 = vpop.f32.mrb[2].mxu1 }
 0x28d   :  { %v1638_v55 = vadd.f32 %v3362_v21, %v4727_v23  ;;  %v1552_v22 = vpop.f32.mrb[3].mxu1  ;;  %v1653_v54 = vmax.f32 %v1637_v47, 0.0 }
 0x28e   :  { %v1636_v53 = vadd.f32 %v4727_v23, %v1552_v22  ;;  %v1651_v59 = vmax.f32 %v1635_v6, 0.0 }
 0x28f   :  { %v1654_v1 = vmax.f32 %v1638_v55, 0.0 }
 0x290   :  { %v1652_v19 = vmax.f32 %v1636_v53, 0.0 }
 0x291   :  { %v4733_v0 = vpack.c.bf16 %v1654_v1, %v1653_v54 }
 0x292   :  { %v4735_v51 = vpack.c.bf16 %v1652_v19, %v1651_v59  ;;  %v3365_v3 = vpop.f32.mrb[4].mxu1  ;;  %v3785_v19 = vld [vmem:[#allocation8 + $0x28] sm:$0xff]  }
 0x293   :  { %v1641_v13 = vadd.f32 %v3365_v3, %v4727_v23  ;;  %v1565_v60 = vpop.f32.mrb[5].mxu1  ;;  %3449 = vmatprep.subr.bf16.mxu1 %v3785_v19 }
 0x294   :  { %v1639_v49 = vadd.f32 %v4727_v23, %v1565_v60  ;;  %v3366_v5 = vpop.f32.mrb[6].mxu1  ;;  %3375 = vmatprep.subr.bf16.mxu0 %v4735_v51  ;;  %3450 = vmatpush3.bf16.msra.mxu1 %v3785_v19 }
 0x295   :  { %v1642_v56 = vadd.f32 %v3366_v5, %v4727_v23  ;;  %v1568_v31 = vpop.f32.mrb[7].mxu1  ;;  %3376 = vmatpush3.bf16.msra.mxu0 %v4735_v51  ;;  %v1657_v47 = vmax.f32 %v1641_v13, 0.0 }
 0x296   :  { %v1640_v50 = vadd.f32 %v4727_v23, %v1568_v31  ;;  %3377 = vmatprep.subr.bf16.mxu0 %v4733_v0  ;;  %v1655_v6 = vmax.f32 %v1639_v49, 0.0 }
 0x297   :  { %v1658_v30 = vmax.f32 %v1642_v56, 0.0 }
 0x298   :  { %v1656_v21 = vmax.f32 %v1640_v50, 0.0 }
 0x299   :  { %v4744_v12 = vpack.c.bf16 %v1658_v30, %v1657_v47  ;;  %3378 = vmatpush3.bf16.msra.mxu0 %v4733_v0 }
 0x29a   :  { %v4747_v55 = vpack.c.bf16 %v1656_v21, %v1655_v6  ;;  %v3369_v22 = vpop.f32.mrb[8].mxu1 }
 0x29b   :  { %v1645_v53 = vadd.f32 %v3369_v22, %v4727_v23  ;;  %v1581_v54 = vpop.f32.mrb[9].mxu1 }
 0x29c   :  { %v1643_v1 = vadd.f32 %v4727_v23, %v1581_v54  ;;  %v3370_v59 = vpop.f32.mrb[10].mxu1  ;;  %3379 = vmatprep.subr.bf16.mxu0 %v4747_v55 }
 0x29d   :  { %v1646_v28 = vadd.f32 %v3370_v59, %v4727_v23  ;;  %v1584_v3 = vpop.f32.mrb[11].mxu1  ;;  %3380 = vmatpush3.bf16.msra.mxu0 %v4747_v55  ;;  %v1661_v60 = vmax.f32 %v1645_v53, 0.0 }
 0x29e   :  { %v1644_v13 = vadd.f32 %v4727_v23, %v1584_v3  ;;  %3381 = vmatprep.subr.bf16.mxu0 %v4744_v12  ;;  %v1659_v5 = vmax.f32 %v1643_v1, 0.0 }
 0x29f   :  { %v1662_v49 = vmax.f32 %v1646_v28, 0.0 }
 0x2a0   :  { %v1660_v16 = vmax.f32 %v1644_v13, 0.0  ;;  %v3824_v13 = vld [vmem:[%s4994_s1 + $0x10] sm:$0xff]  }
 0x2a1   :  { %v4756_v56 = vpack.c.bf16 %v1662_v49, %v1661_v60  ;;  %3382 = vmatpush3.bf16.msra.mxu0 %v4744_v12  ;;  %v3825_v60 = vld [vmem:[%s4994_s1 + $0x18] sm:$0xff]   ;;  %v3826_v49 = vld [vmem:[%s4994_s1 + $0x20] sm:$0xff]  }
 0x2a2   :  { %v4759_v31 = vpack.c.bf16 %v1660_v16, %v1659_v5  ;;  %v3373_v50 = vpop.f32.mrb[12].mxu1  ;;  %v3827_v5 = vld [vmem:[%s4994_s1 + $0x28] sm:$0xff]   ;;  %v3828_v16 = vld [vmem:[%s4994_s1 + $0x30] sm:$0xff]  }
 0x2a3   :  { %v1649_v47 = vadd.f32 %v3373_v50, %v4727_v23  ;;  %v1597_v30 = vpop.f32.mrb[13].mxu1  ;;  %v3829_v50 = vld [vmem:[%s4994_s1 + $0x38] sm:$0xff]  }
 0x2a4   :  { %v1647_v6 = vadd.f32 %v4727_v23, %v1597_v30  ;;  %v3374_v21 = vpop.f32.mrb[14].mxu1  ;;  %3383 = vmatprep.subr.bf16.mxu0 %v4759_v31  ;;  %v3831_v30 = vld [vmem:[%s4994_s1 + $0x48] sm:$0xff]  }
 0x2a5   :  { %v1650_v2 = vadd.f32 %v3374_v21, %v4727_v23  ;;  %v1600_v22 = vpop.f32.mrb[15].mxu1  ;;  %3384 = vmatpush3.bf16.msra.mxu0 %v4759_v31  ;;  %v1665_v54 = vmax.f32 %v1649_v47, 0.0  ;;  %v3830_v47 = vld [vmem:[%s4994_s1 + $0x40] sm:$0xff]   ;;  %v3833_v21 = vld [vmem:[%s4994_s1 + $0x58] sm:$0xff]  }
 0x2a6   :  { %v1648_v53 = vadd.f32 %v4727_v23, %v1600_v22  ;;  %3385 = vmatprep.subr.bf16.mxu0 %v4756_v56  ;;  %v1663_v59 = vmax.f32 %v1647_v6, 0.0  ;;  %v3823_v23 = vld [vmem:[%s4994_s1 + $0x8] sm:$0xff]   ;;  %v3832_v6 = vld [vmem:[%s4994_s1 + $0x50] sm:$0xff]  }
 0x2a7   :  { %v1666_v1 = vmax.f32 %v1650_v2, 0.0  ;;  %v3834_v2 = vld [vmem:[%s4994_s1 + $0x60] sm:$0xff]   ;;  %v3786_v22 = vld [vmem:[#allocation8 + $0x30] sm:$0xff]  }
 0x2a8   :  { %v1664_v28 = vmax.f32 %v1648_v53, 0.0  ;;  %3451 = vmatprep.subr.bf16.mxu1 %v3786_v22 }
 0x2a9   :  { %v4768_v3 = vpack.c.bf16 %v1666_v1, %v1665_v54  ;;  %3386 = vmatpush3.bf16.msra.mxu0 %v4756_v56  ;;  %3452 = vmatpush3.bf16.msra.mxu1 %v3786_v22  ;;  %v3789_v1 = vld [vmem:[#allocation7 + $0x8] sm:$0xff]  }
 0x2aa   :  { %v4771_v19 = vpack.c.bf16 %v1664_v28, %v1663_v59  ;;  %v3793_v22 = vld [vmem:[#allocation7 + $0x28] sm:$0xff]  }
 0x2ac   :  { %3387 = vmatprep.subr.bf16.mxu0 %v4771_v19 }
 0x2ad   :  { %3388 = vmatpush3.bf16.msra.mxu0 %v4771_v19 }
 0x2ae   :  { %3389 = vmatprep.subr.bf16.mxu0 %v4768_v3 }
 0x2b1   :  { %3390 = vmatpush3.bf16.msra.mxu0 %v4768_v3 }
 0x2b4   :  { %3392 = vmatmul.mubr.bf16.vlgmr.msra.gmra.mrb[48].mxu0 %v3823_v23 }
 0x2b5   :  { %3395 = vmatprep.mubr.bf16.mxu0 %v3824_v13 }
 0x2bc   :  { %3396 = vmatmul.mubr.bf16.gmra.mrb[52].mxu0 %v3825_v60 }
 0x2bd   :  { %3399 = vmatprep.mubr.bf16.mxu0 %v3826_v49 }
 0x2c4   :  { %3400 = vmatmul.mubr.bf16.gmra.mrb[56].mxu0 %v3827_v5  ;;  %v3791_v5 = vld [vmem:[#allocation7 + $0x18] sm:$0xff]  }
 0x2c5   :  { %3403 = vmatprep.mubr.bf16.mxu0 %v3828_v16 }
 0x2cc   :  { %3404 = vmatmul.mubr.bf16.gmra.mrb[60].mxu0 %v3829_v50 }
 0x2cd   :  { %3407 = vmatprep.mubr.bf16.mxu0 %v3830_v47 }
 0x2d4   :  { %3408 = vmatmul.mubr.bf16.gmra.mrb[64].mxu0 %v3831_v30 }
 0x2d5   :  { %3411 = vmatprep.mubr.bf16.mxu0 %v3832_v6 }
 0x2dc   :  { %3412 = vmatmul.mubr.bf16.gmra.mrb[68].mxu0 %v3833_v21 }
 0x2dd   :  { %3415 = vmatprep.mubr.bf16.mxu0 %v3834_v2 }
 0x2e4   :  { %3416 = vmatmul.mubr.bf16.gmra.mrb[72].mxu0 %v4322_v61  ;;  %v3787_v61 = vld [vmem:[#allocation8 + $0x38] sm:$0xff]  }
 0x2e5   :  { %3419 = vmatprep.mubr.bf16.mxu0 %v4327_v62  ;;  %3453 = vmatprep.subr.bf16.mxu1 %v3787_v61  ;;  %v3788_v62 = vld [vmem:[#allocation7] sm:$0xff]  }
 0x2e6   :  { %3454 = vmatpush3.bf16.msra.mxu1 %v3787_v61 }
 0x2e7   :  { %3471 = vmatprep.subr.bf16.mxu1 %v3788_v62 }
 0x2ec   :  { %3420 = vmatmul.mubr.bf16.gmra.mrb[76].mxu0 %v4352_v7 }
 0x2ed   :  { %3423 = vmatprep.mubr.bf16.mxu0 %v4357_v8 }
 0x2f4   :  { %3424 = vmatmul.mubr.bf16.gmra.mrb[80].mxu0 %v4382_v18 }
 0x2f5   :  { %3427 = vmatprep.mubr.bf16.mxu0 %v4387_v20 }
 0x2fc   :  { %3428 = vmatmul.mubr.bf16.gmra.mrb[84].mxu0 %v4403_v24 }
 0x2fd   :  { %3431 = vmatprep.mubr.bf16.mxu0 %v4408_v25 }
 0x304   :  { %3432 = vmatmul.mubr.bf16.gmra.mrb[88].mxu0 %v4415_v26 }
 0x305   :  { %3435 = vmatprep.mubr.bf16.mxu0 %v4420_v27 }
 0x30c   :  { %3436 = vmatmul.mubr.bf16.gmra.mrb[92].mxu0 %v4430_v29 }
 0x387   :  { %v3393_v7 = vpop.f32.mrb[48].mxu0 }
 0x388   :  { %v1725_v8 = vpop.f32.mrb[49].mxu0  ;;  %v1918_v20 = vmul.f32 %v3393_v7, %v4439_v33 }
 0x389   :  { %v3394_v18 = vpop.f32.mrb[50].mxu0  ;;  %v1916_v26 = vmul.f32 %v1725_v8, %v4437_v32 }
 0x38a   :  { %v1919_v24 = vmul.f32 %v3394_v18, %v4443_v35  ;;  %v1728_v25 = vpop.f32.mrb[51].mxu0  ;;  %v3790_v35 = vld [vmem:[#allocation7 + $0x10] sm:$0xff]  }
 0x38b   :  { %v1917_v27 = vmul.f32 %v1728_v25, %v4441_v34  ;;  %v3795_v25 = vld [vmem:[#allocation7 + $0x38] sm:$0xff]  }
 0x38c   :  { %v1965_v53 = vpack.c.bf16 %v1919_v24, %v1918_v20 }
 0x38d   :  { %v1964_v54 = vpack.c.bf16 %v1917_v27, %v1916_v26 }
 0x38f   :  { %v3397_v29 = vpop.f32.mrb[52].mxu0  ;;  %3455 = vmatprep.mubr.bf16.mxu1 %v1964_v54  ;;  %v3796_v54 = vld [vmem:[#allocation8 + $0x40] sm:$0xff]  }
 0x390   :  { %v1741_v59 = vpop.f32.mrb[53].mxu0  ;;  %3456 = vmatmul.mubr.bf16.vlgmr.msra.gmra.mrb[16].mxu1 %v1965_v53  ;;  %v1922_v23 = vmul.f32 %v3397_v29, %v4449_v38 }
 0x391   :  { %v3398_v28 = vpop.f32.mrb[54].mxu0  ;;  %3472 = vmatpush3.bf16.msra.mxu1 %v3788_v62  ;;  %v1920_v32 = vmul.f32 %v1741_v59, %v4445_v36  ;;  %v3792_v36 = vld [vmem:[#allocation7 + $0x20] sm:$0xff]   ;;  %v5060_v59 = vld [vmem:[#allocation17_spill] sm:$0xff] }
 0x392   :  { %v1923_v33 = vmul.f32 %v3398_v28, %v4451_v39  ;;  %v1744_v13 = vpop.f32.mrb[55].mxu0  ;;  %3473 = vmatprep.subr.bf16.mxu1 %v3789_v1 }
 0x393   :  { %v1921_v34 = vmul.f32 %v1744_v13, %v4447_v37 }
 0x394   :  { %v1967_v60 = vpack.c.bf16 %v1923_v33, %v1922_v23 }
 0x395   :  { %v1966_v49 = vpack.c.bf16 %v1921_v34, %v1920_v32  ;;  %3474 = vmatpush3.bf16.msra.mxu1 %v3789_v1  ;;  %v5059_v1 = vld [vmem:[#allocation16_spill] sm:$0xff]  ;;  %v5061_v32 = vld [vmem:[#allocation21_spill] sm:$0xff] }
 0x396   :  { %3475 = vmatprep.subr.bf16.mxu1 %v3790_v35 }
 0x397   :  { %v3401_v16 = vpop.f32.mrb[56].mxu0  ;;  %3459 = vmatprep.mubr.bf16.mxu1 %v1966_v49 }
 0x398   :  { %v1757_v50 = vpop.f32.mrb[57].mxu0  ;;  %3460 = vmatmul.mubr.bf16.gmra.mrb[20].mxu1 %v1967_v60  ;;  %v1926_v38 = vmul.f32 %v3401_v16, %v4457_v41  ;;  %v5062_v60 = vld [vmem:[#allocation22_spill] sm:$0xff]  ;;  %v3798_v16 = vld [vmem:[#allocation8 + $0x50] sm:$0xff]  }
 0x399   :  { %v3402_v47 = vpop.f32.mrb[58].mxu0  ;;  %3476 = vmatpush3.bf16.msra.mxu1 %v3790_v35  ;;  %v1924_v37 = vmul.f32 %v1757_v50, %v4453_v40  ;;  %v3794_v40 = vld [vmem:[#allocation7 + $0x30] sm:$0xff]   ;;  %v5063_v50 = vld [vmem:[#allocation19_spill] sm:$0xff] }
 0x39a   :  { %v1927_v39 = vmul.f32 %v3402_v47, %v4459_v42  ;;  %v1760_v30 = vpop.f32.mrb[59].mxu0  ;;  %3477 = vmatprep.subr.bf16.mxu1 %v3791_v5 }
 0x39b   :  { %v1925_v6 = vmul.f32 %v1760_v30, %v4455_v9  ;;  %v3799_v30 = vld [vmem:[#allocation8 + $0x58] sm:$0xff]  }
 0x39c   :  { %v1969_v21 = vpack.c.bf16 %v1927_v39, %v1926_v38  ;;  %v5064_v38 = vld [vmem:[#allocation20_spill] sm:$0xff] }
 0x39d   :  { %v1968_v2 = vpack.c.bf16 %v1925_v6, %v1924_v37  ;;  %3478 = vmatpush3.bf16.msra.mxu1 %v3791_v5 }
 0x39e   :  { %3479 = vmatprep.subr.bf16.mxu1 %v3792_v36 }
 0x39f   :  { %v3405_v61 = vpop.f32.mrb[60].mxu0  ;;  %3463 = vmatprep.mubr.bf16.mxu1 %v1968_v2 }
 0x3a0   :  { %v1773_v62 = vpop.f32.mrb[61].mxu0  ;;  %3464 = vmatmul.mubr.bf16.gmra.mrb[24].mxu1 %v1969_v21  ;;  %v1930_v41 = vmul.f32 %v3405_v61, %v4465_v45  ;;  %v5065_v21 = vld [vmem:[#allocation25_spill] sm:$0xff] }
 0x3a1   :  { %v3406_v7 = vpop.f32.mrb[62].mxu0  ;;  %3480 = vmatpush3.bf16.msra.mxu1 %v3792_v36  ;;  %v1928_v9 = vmul.f32 %v1773_v62, %v4461_v43 }
 0x3a2   :  { %v1931_v42 = vmul.f32 %v3406_v7, %v4467_v46  ;;  %v1776_v8 = vpop.f32.mrb[63].mxu0  ;;  %3481 = vmatprep.subr.bf16.mxu1 %v3793_v22  ;;  %v5058_v46 = vld [vmem:[#allocation18_spill] sm:$0xff]  ;;  %v3800_v7 = vld [vmem:[#allocation8 + $0x60] sm:$0xff]  }
 0x3a3   :  { %v1929_v18 = vmul.f32 %v1776_v8, %v4463_v44  ;;  %v5068_v8 = vld [vmem:[#allocation24_spill] sm:$0xff] }
 0x3a4   :  { %v1971_v20 = vpack.c.bf16 %v1931_v42, %v1930_v41  ;;  %v5067_v41 = vld [vmem:[#allocation23_spill] sm:$0xff] }
 0x3a5   :  { %v1970_v24 = vpack.c.bf16 %v1929_v18, %v1928_v9  ;;  %3482 = vmatpush3.bf16.msra.mxu1 %v3793_v22  ;;  %v5066_v22 = vld [vmem:[#allocation26_spill] sm:$0xff]  ;;  %v3801_v9 = vld [vmem:[#allocation8 + $0x68] sm:$0xff]  }
 0x3a6   :  { %3483 = vmatprep.subr.bf16.mxu1 %v3794_v40 }
 0x3a7   :  { %v3409_v26 = vpop.f32.mrb[64].mxu0  ;;  %3467 = vmatprep.mubr.bf16.mxu1 %v1970_v24 }
 0x3a8   :  { %v1789_v27 = vpop.f32.mrb[65].mxu0  ;;  %3468 = vmatmul.mubr.bf16.gmra.mrb[28].mxu1 %v1971_v20  ;;  %v4842_v45 = vmul.f32 %v3409_v26, %v4477_v57  ;;  %v3797_v57 = vld [vmem:[#allocation8 + $0x48] sm:$0xff]  }
 0x3a9   :  { %v3410_v53 = vpop.f32.mrb[66].mxu0  ;;  %3484 = vmatpush3.bf16.msra.mxu1 %v3794_v40  ;;  %3487 = vmatprep.mubr.bf16.mxu1 %v4735_v51  ;;  %v4848_v29 = vmul.f32 %v1789_v27, %v5059_v1  ;;  %v5070_v27 = vld [vmem:[#allocation30_spill] sm:$0xff] }
 0x3aa   :  { %v4845_v43 = vmul.f32 %v3410_v53, %v5058_v46  ;;  %v1792_v44 = vpop.f32.mrb[67].mxu0  ;;  %3485 = vmatprep.subr.bf16.mxu1 %v3795_v25 }
 0x3ab   :  { %v4851_v28 = vmul.f32 %v1792_v44, %v5060_v59  ;;  %v3802_v44 = vld [vmem:[#allocation8 + $0x70] sm:$0xff]  }
 0x3ac   :  { %v2279_v23 = vpack.c.bf16 %v4845_v43, %v4842_v45  ;;  %v3807_v45 = vld [vmem:[#allocation8 + $0x98] sm:$0xff]  }
 0x3ad   :  { %v2278_v51 = vpack.c.bf16 %v4851_v28, %v4848_v29  ;;  %3486 = vmatpush3.bf16.msra.mxu1 %v3795_v25  ;;  %v5069_v25 = vld [vmem:[#allocation29_spill] sm:$0xff]  ;;  %v5072_v29 = vld [vmem:[#allocation28_spill] sm:$0xff]  ;;  %v3803_v28 = vld [vmem:[#allocation8 + $0x78] sm:$0xff]  }
 0x3ae   :  { %3503 = vmatprep.subr.bf16.mxu1 %v3796_v54 }
 0x3af   :  { %v3413_v33 = vpop.f32.mrb[68].mxu0 }
 0x3b0   :  { %v1805_v13 = vpop.f32.mrb[69].mxu0  ;;  %3488 = vmatmul.mubr.bf16.vlgmr.msra.gmra.mrb[16].mxu1 %v4733_v0  ;;  %v4860_v34 = vmul.f32 %v3413_v33, %v5061_v32 }
 0x3b1   :  { %v3414_v35 = vpop.f32.mrb[70].mxu0  ;;  %3491 = vmatprep.mubr.bf16.mxu1 %v4747_v55  ;;  %3504 = vmatpush3.bf16.msra.mxu1 %v3796_v54  ;;  %v4866_v47 = vmul.f32 %v1805_v13, %v5063_v50  ;;  %v5071_v54 = vld [vmem:[#allocation27_spill] sm:$0xff] }
 0x3b2   :  { %v4863_v49 = vmul.f32 %v3414_v35, %v5062_v60  ;;  %v1808_v5 = vpop.f32.mrb[71].mxu0  ;;  %3505 = vmatprep.subr.bf16.mxu1 %v3797_v57  ;;  %v5073_v35 = vld [vmem:[#allocation33_spill] sm:$0xff]  ;;  %v5074_v60 = vld [vmem:[#allocation34_spill] sm:$0xff]  ;;  %v3804_v50 = vld [vmem:[#allocation8 + $0x80] sm:$0xff]  }
 0x3b3   :  { %v4869_v39 = vmul.f32 %v1808_v5, %v5064_v38 }
 0x3b4   :  { %v2281_v0 = vpack.c.bf16 %v4863_v49, %v4860_v34  ;;  %v3809_v34 = vld [vmem:[#allocation8 + $0xa8] sm:$0xff]  }
 0x3b5   :  { %v2280_v55 = vpack.c.bf16 %v4869_v39, %v4866_v47  ;;  %3506 = vmatpush3.bf16.msra.mxu1 %v3797_v57  ;;  %v5075_v47 = vld [vmem:[#allocation31_spill] sm:$0xff]  ;;  %v5076_v39 = vld [vmem:[#allocation32_spill] sm:$0xff] }
 0x3b6   :  { %3507 = vmatprep.subr.bf16.mxu1 %v3798_v16 }
 0x3b7   :  { %v3417_v36 = vpop.f32.mrb[72].mxu0 }
 0x3b8   :  { %v1821_v37 = vpop.f32.mrb[73].mxu0  ;;  %3492 = vmatmul.mubr.bf16.gmra.mrb[20].mxu1 %v4744_v12  ;;  %v4878_v2 = vmul.f32 %v3417_v36, %v5065_v21 }
 0x3b9   :  { %v3418_v6 = vpop.f32.mrb[74].mxu0  ;;  %3495 = vmatprep.mubr.bf16.mxu1 %v4759_v31  ;;  %3508 = vmatpush3.bf16.msra.mxu1 %v3798_v16  ;;  %v4884_v42 = vmul.f32 %v1821_v37, %v5067_v41  ;;  %v3806_v41 = vld [vmem:[#allocation8 + $0x90] sm:$0xff]  }
 0x3ba   :  { %v4881_v61 = vmul.f32 %v3418_v6, %v5066_v22  ;;  %v1824_v62 = vpop.f32.mrb[75].mxu0  ;;  %3509 = vmatprep.subr.bf16.mxu1 %v3799_v30 }
 0x3bb   :  { %v4887_v40 = vmul.f32 %v1824_v62, %v5068_v8 }
 0x3bc   :  { %v2283_v12 = vpack.c.bf16 %v4881_v61, %v4878_v2  ;;  %v3811_v2 = vld [vmem:[#allocation8 + $0xb8] sm:$0xff]  }
 0x3bd   :  { %v2282_v31 = vpack.c.bf16 %v4887_v40, %v4884_v42  ;;  %3510 = vmatpush3.bf16.msra.mxu1 %v3799_v30 }
 0x3be   :  { %3511 = vmatprep.subr.bf16.mxu1 %v3800_v7 }
 0x3bf   :  { %v3421_v18 = vpop.f32.mrb[76].mxu0 }
 0x3c0   :  { %v1837_v20 = vpop.f32.mrb[77].mxu0  ;;  %3496 = vmatmul.mubr.bf16.gmra.mrb[24].mxu1 %v4756_v56  ;;  %v4896_v26 = vmul.f32 %v3421_v18, %v5069_v25  ;;  %v5078_v18 = vld [vmem:[#allocation36_spill] sm:$0xff] }
 0x3c1   :  { %v3422_v24 = vpop.f32.mrb[78].mxu0  ;;  %3499 = vmatprep.mubr.bf16.mxu1 %v4771_v19  ;;  %3512 = vmatpush3.bf16.msra.mxu1 %v3800_v7  ;;  %v4902_v1 = vmul.f32 %v1837_v20, %v5071_v54 }
 0x3c2   :  { %v4899_v53 = vmul.f32 %v3422_v24, %v5070_v27  ;;  %v1840_v46 = vpop.f32.mrb[79].mxu0  ;;  %3513 = vmatprep.subr.bf16.mxu1 %v3801_v9 }
 0x3c3   :  { %v4905_v59 = vmul.f32 %v1840_v46, %v5072_v29 }
 0x3c4   :  { %v2285_v56 = vpack.c.bf16 %v4899_v53, %v4896_v26 }
 0x3c5   :  { %v2284_v19 = vpack.c.bf16 %v4905_v59, %v4902_v1  ;;  %3514 = vmatpush3.bf16.msra.mxu1 %v3801_v9 }
 0x3c6   :  { %3515 = vmatprep.subr.bf16.mxu1 %v3802_v44 }
 0x3c7   :  { %v3425_v57 = vpop.f32.mrb[80].mxu0 }
 0x3c8   :  { %v1853_v33 = vpop.f32.mrb[81].mxu0  ;;  %3500 = vmatmul.mubr.bf16.gmra.mrb[28].mxu1 %v4768_v3  ;;  %v4913_v32 = vmul.f32 %v3425_v57, %v5073_v35 }
 0x3c9   :  { %v3426_v13 = vpop.f32.mrb[82].mxu0  ;;  %3516 = vmatpush3.bf16.msra.mxu1 %v3802_v44  ;;  %3519 = vmatprep.mubr.bf16.mxu1 %v2278_v51  ;;  %v4919_v38 = vmul.f32 %v1853_v33, %v5075_v47  ;;  %v3805_v51 = vld [vmem:[#allocation8 + $0x88] sm:$0xff]  }
 0x3ca   :  { %v4916_v5 = vmul.f32 %v3426_v13, %v5074_v60  ;;  %v1856_v16 = vpop.f32.mrb[83].mxu0  ;;  %3517 = vmatprep.subr.bf16.mxu1 %v3803_v28 }
 0x3cb   :  { %v1949_v30 = vmul.f32 %v1856_v16, %v5076_v39 }
 0x3cc   :  { %v2464_v3 = vpack.c.bf16 %v4916_v5, %v4913_v32 }
 0x3cd   :  { %v2463_v36 = vpack.c.bf16 %v1949_v30, %v4919_v38  ;;  %3518 = vmatpush3.bf16.msra.mxu1 %v3803_v28 }
 0x3ce   :  { %3535 = vmatprep.subr.bf16.mxu1 %v3804_v50 }
 0x3cf   :  { %v3429_v37 = vpop.f32.mrb[84].mxu0 }
 0x3d0   :  { %v1869_v6 = vpop.f32.mrb[85].mxu0  ;;  %3520 = vmatmul.mubr.bf16.vlgmr.msra.gmra.mrb[16].mxu1 %v2279_v23  ;;  %v1954_v22 = vmul.f32 %v3429_v37, %v4621_v17 }
 0x3d1   :  { %v3430_v21 = vpop.f32.mrb[86].mxu0  ;;  %3523 = vmatprep.mubr.bf16.mxu1 %v2280_v55  ;;  %3536 = vmatpush3.bf16.msra.mxu1 %v3804_v50  ;;  %v1952_v42 = vmul.f32 %v1869_v6, %v4595_v10 }
 0x3d2   :  { %v1955_v62 = vmul.f32 %v3430_v21, %v4624_v14  ;;  %v1872_v7 = vpop.f32.mrb[87].mxu0  ;;  %3537 = vmatprep.subr.bf16.mxu1 %v3805_v51  ;;  %v5077_v14 = vld [vmem:[#allocation35_spill] sm:$0xff] }
 0x3d3   :  { %v1953_v8 = vmul.f32 %v1872_v7, %v4606_v48  ;;  %v3808_v48 = vld [vmem:[#allocation8 + $0xa0] sm:$0xff]  }
 0x3d4   :  { %v2466_v40 = vpack.c.bf16 %v1955_v62, %v1954_v22 }
 0x3d5   :  { %v2465_v9 = vpack.c.bf16 %v1953_v8, %v1952_v42  ;;  %3538 = vmatpush3.bf16.msra.mxu1 %v3805_v51 }
 0x3d6   :  { %3539 = vmatprep.subr.bf16.mxu1 %v3806_v41 }
 0x3d7   :  { %v3433_v43 = vpop.f32.mrb[88].mxu0 }
 0x3d8   :  { %v1885_v23 = vpop.f32.mrb[89].mxu0  ;;  %3524 = vmatmul.mubr.bf16.gmra.mrb[20].mxu1 %v2281_v0  ;;  %v1958_v55 = vmul.f32 %v3433_v43, %v5077_v14 }
 0x3d9   :  { %v3434_v17 = vpop.f32.mrb[90].mxu0  ;;  %3527 = vmatprep.mubr.bf16.mxu1 %v2282_v31  ;;  %3540 = vmatpush3.bf16.msra.mxu1 %v3806_v41  ;;  %v1956_v24 = vmul.f32 %v1885_v23, %v4648_v4 }
 0x3da   :  { %v1959_v10 = vmul.f32 %v3434_v17, %v5078_v18  ;;  %v1888_v20 = vpop.f32.mrb[91].mxu0  ;;  %3541 = vmatprep.subr.bf16.mxu1 %v3807_v45 }
 0x3db   :  { %v1957_v25 = vmul.f32 %v1888_v20, %v4653_v63  ;;  %v3810_v63 = vld [vmem:[#allocation8 + $0xb0] sm:$0xff]  }
 0x3dc   :  { %v2468_v27 = vpack.c.bf16 %v1959_v10, %v1958_v55 }
 0x3dd   :  { %v2467_v46 = vpack.c.bf16 %v1957_v25, %v1956_v24  ;;  %3542 = vmatpush3.bf16.msra.mxu1 %v3807_v45 }
 0x3de   :  { %3543 = vmatprep.subr.bf16.mxu1 %v3808_v48 }
 0x3df   :  { %v3437_v49 = vpop.f32.mrb[92].mxu0 }
 0x3e0   :  { %v1901_v0 = vpop.f32.mrb[93].mxu0  ;;  %3528 = vmatmul.mubr.bf16.gmra.mrb[24].mxu1 %v2283_v12  ;;  %v1962_v44 = vmul.f32 %v3437_v49, %v4695_v15 }
 0x3e1   :  { %v3438_v31 = vpop.f32.mrb[94].mxu0  ;;  %3531 = vmatprep.mubr.bf16.mxu1 %v2284_v19  ;;  %3544 = vmatpush3.bf16.msra.mxu1 %v3808_v48  ;;  %v1960_v1 = vmul.f32 %v1901_v0, %v4681_v11  ;;  %v2963_v11 = vld [vmem:[%s5001_s8] ss:$0 sm:$0xff] }
 0x3e2   :  { %v1963_v4 = vmul.f32 %v3438_v31, %v4700_v58  ;;  %v1904_v54 = vpop.f32.mrb[95].mxu0  ;;  %3545 = vmatprep.subr.bf16.mxu1 %v3809_v34  ;;  %v3983_v58 = vmov 0.0  }
 0x3e3   :  { %v1961_v29 = vmul.f32 %v1904_v54, %v4688_v52  ;;  %3567 = vmatprep.subr.bf16.mxu0 %v3983_v58  ;;  %3583 = vmatprep.mubr.msk.bf16.mxu0 %vm3984_vm0, %v3983_v58 }
 0x3e4   :  { %v2470_v59 = vpack.c.bf16 %v1963_v4, %v1962_v44 }
 0x3e5   :  { %v2469_v28 = vpack.c.bf16 %v1961_v29, %v1960_v1  ;;  %3546 = vmatpush3.bf16.msra.mxu1 %v3809_v34  ;;  %v3812_v1 = vld [vmem:[#allocation10] sm:$0xff]   ;;  %v3813_v29 = vld [vmem:[#allocation10 + $0x8] sm:$0xff]  }
 0x3e6   :  { %3547 = vmatprep.subr.bf16.mxu1 %v3810_v63 }
 0x3e8   :  { %3532 = vmatmul.mubr.bf16.gmra.mrb[28].mxu1 %v2285_v56 }
 0x3e9   :  { %3548 = vmatpush3.bf16.msra.mxu1 %v3810_v63  ;;  %3551 = vmatprep.mubr.bf16.mxu1 %v2463_v36  ;;  %v2687_v63 = vld [vmem:[%s5002_s9] sm:$0xf] }
 0x3ea   :  { %3549 = vmatprep.subr.bf16.mxu1 %v3811_v2 }
 0x3ed   :  { %3550 = vmatpush3.bf16.msra.mxu1 %v3811_v2  ;;  %v3816_v2 = vld [vmem:[#allocation10 + $0x20] sm:$0xff]  }
 0x3f0   :  { %3552 = vmatmul.mubr.bf16.vlgmr.msra.gmra.mrb[16].mxu1 %v2464_v3 }
 0x3f1   :  { %3555 = vmatprep.mubr.bf16.mxu1 %v2465_v9 }
 0x3f8   :  { %3556 = vmatmul.mubr.bf16.gmra.mrb[20].mxu1 %v2466_v40 }
 0x3f9   :  { %3559 = vmatprep.mubr.bf16.mxu1 %v2467_v46 }
 0x400   :  { %3560 = vmatmul.mubr.bf16.gmra.mrb[24].mxu1 %v2468_v27 }
 0x401   :  { %3563 = vmatprep.mubr.bf16.mxu1 %v2469_v28  ;;  %v3815_v28 = vld [vmem:[#allocation10 + $0x18] sm:$0xff]  }
 0x408   :  { %3564 = vmatmul.mubr.bf16.gmra.mrb[28].mxu1 %v2470_v59  ;;  %v3814_v59 = vld [vmem:[#allocation10 + $0x10] sm:$0xff]  }
 0x4c3   :  { %v3553_v52 = vpop.f32.mrb[16].mxu1 }
 0x4c4   :  { %v2657_v15 = vadd.f32 %v3553_v52, %v2963_v11  ;;  %v2569_v61 = vpop.f32.mrb[17].mxu1  ;;  %v3818_v52 = vld [vmem:[#allocation10 + $0x30] sm:$0xff]  }
 0x4c5   :  { %v2655_v12 = vadd.f32 %v2963_v11, %v2569_v61  ;;  %v3554_v26 = vpop.f32.mrb[18].mxu1 }
 0x4c6   :  { %v2658_v53 = vadd.f32 %v3554_v26, %v2963_v11  ;;  %v2572_v56 = vpop.f32.mrb[19].mxu1  ;;  %v2673_v57 = vmax.f32 %v2657_v15, 0.0  ;;  %v3819_v15 = vld [vmem:[#allocation10 + $0x38] sm:$0xff]  }
 0x4c7   :  { %v2656_v19 = vadd.f32 %v2963_v11, %v2572_v56  ;;  %v2671_v13 = vmax.f32 %v2655_v12, 0.0 }
 0x4c8   :  { %v2674_v33 = vmax.f32 %v2658_v53, 0.0 }
 0x4c9   :  { %v2672_v35 = vmax.f32 %v2656_v19, 0.0  ;;  %v2964_v19 = vld [vmem:[%s5004_s11] ss:$0 sm:$0xff] }
 0x4ca   :  { %v2689_v32 = vpack.c.bf16 %v2674_v33, %v2673_v57 }
 0x4cb   :  { %v2688_v60 = vpack.c.bf16 %v2672_v35, %v2671_v13  ;;  %v3557_v5 = vpop.f32.mrb[20].mxu1 }
 0x4cc   :  { %v2661_v16 = vadd.f32 %v3557_v5, %v2963_v11  ;;  %v2585_v50 = vpop.f32.mrb[21].mxu1 }
 0x4cd   :  { %v2659_v47 = vadd.f32 %v2963_v11, %v2585_v50  ;;  %v3558_v38 = vpop.f32.mrb[22].mxu1  ;;  %3568 = vmatpush3.bf16.msra.mxu0 %v2688_v60 }
 0x4ce   :  { %v2662_v39 = vadd.f32 %v3558_v38, %v2963_v11  ;;  %v2588_v30 = vpop.f32.mrb[23].mxu1  ;;  %3569 = vmatprep.subr.bf16.mxu0 %v3983_v58  ;;  %v2677_v36 = vmax.f32 %v2661_v16, 0.0 }
 0x4cf   :  { %v2660_v3 = vadd.f32 %v2963_v11, %v2588_v30  ;;  %v2675_v37 = vmax.f32 %v2659_v47, 0.0 }
 0x4d0   :  { %v2678_v51 = vmax.f32 %v2662_v39, 0.0 }
 0x4d1   :  { %v2676_v6 = vmax.f32 %v2660_v3, 0.0  ;;  %3570 = vmatpush3.bf16.msra.mxu0 %v2689_v32 }
 0x4d2   :  { %v2691_v21 = vpack.c.bf16 %v2678_v51, %v2677_v36  ;;  %3571 = vmatprep.subr.bf16.mxu0 %v3983_v58 }
 0x4d3   :  { %v2690_v22 = vpack.c.bf16 %v2676_v6, %v2675_v37  ;;  %v3561_v62 = vpop.f32.mrb[24].mxu1 }
 0x4d4   :  { %v2665_v7 = vadd.f32 %v3561_v62, %v2963_v11  ;;  %v2601_v41 = vpop.f32.mrb[25].mxu1 }
 0x4d5   :  { %v2663_v42 = vadd.f32 %v2963_v11, %v2601_v41  ;;  %v3562_v8 = vpop.f32.mrb[26].mxu1  ;;  %3572 = vmatpush3.bf16.msra.mxu0 %v2690_v22 }
 0x4d6   :  { %v2666_v40 = vadd.f32 %v3562_v8, %v2963_v11  ;;  %v2604_v9 = vpop.f32.mrb[27].mxu1  ;;  %3573 = vmatprep.subr.bf16.mxu0 %v3983_v58  ;;  %v2681_v43 = vmax.f32 %v2665_v7, 0.0 }
 0x4d7   :  { %v2664_v45 = vadd.f32 %v2963_v11, %v2604_v9  ;;  %v2679_v17 = vmax.f32 %v2663_v42, 0.0 }
 0x4d8   :  { %v2682_v23 = vmax.f32 %v2666_v40, 0.0 }
 0x4d9   :  { %v2680_v14 = vmax.f32 %v2664_v45, 0.0  ;;  %3574 = vmatpush3.bf16.msra.mxu0 %v2691_v21 }
 0x4da   :  { %v2693_v55 = vpack.c.bf16 %v2682_v23, %v2681_v43  ;;  %3575 = vmatprep.subr.bf16.mxu0 %v3983_v58 }
 0x4db   :  { %v2692_v18 = vpack.c.bf16 %v2680_v14, %v2679_v17  ;;  %v3565_v10 = vpop.f32.mrb[28].mxu1 }
 0x4dc   :  { %v2669_v20 = vadd.f32 %v3565_v10, %v2963_v11  ;;  %v2617_v48 = vpop.f32.mrb[29].mxu1 }
 0x4dd   :  { %v2667_v24 = vadd.f32 %v2963_v11, %v2617_v48  ;;  %v3566_v25 = vpop.f32.mrb[30].mxu1  ;;  %3576 = vmatpush3.bf16.msra.mxu0 %v2692_v18 }
 0x4de   :  { %v2670_v27 = vadd.f32 %v3566_v25, %v2963_v11  ;;  %v2620_v46 = vpop.f32.mrb[31].mxu1  ;;  %3577 = vmatprep.subr.bf16.mxu0 %v3983_v58  ;;  %v2685_v49 = vmax.f32 %v2669_v20, 0.0 }
 0x4df   :  { %v2668_v34 = vadd.f32 %v2963_v11, %v2620_v46  ;;  %v2683_v31 = vmax.f32 %v2667_v24, 0.0  ;;  %v3817_v11 = vld [vmem:[#allocation10 + $0x28] sm:$0xff]  }
 0x4e0   :  { %v2686_v0 = vmax.f32 %v2670_v27, 0.0 }
 0x4e1   :  { %v2684_v44 = vmax.f32 %v2668_v34, 0.0  ;;  %3578 = vmatpush3.bf16.msra.mxu0 %v2693_v55 }
 0x4e2   :  { %v2695_v4 = vpack.c.bf16 %v2686_v0, %v2685_v49  ;;  %3579 = vmatprep.subr.bf16.mxu0 %v3983_v58 }
 0x4e3   :  { %v2694_v54 = vpack.c.bf16 %v2684_v44, %v2683_v31 }
 0x4e5   :  { %3580 = vmatpush3.bf16.msra.mxu0 %v2694_v54 }
 0x4e6   :  { %3581 = vmatprep.subr.bf16.mxu0 %v3983_v58 }
 0x4e9   :  { %3582 = vmatpush3.bf16.msra.mxu0 %v2695_v4 }
 0x4ea   :  { %3587 = vmatprep.subr.bf16.mxu0 %v3983_v58 }
 0x4ec   :  { %3584 = vmatmul.mubr.bf16.vlgmr.msra.gmra.mrb[96].mxu0 %v2687_v63 }
 0x4ed   :  { %3588 = vmatpush3.bf16.msra.mxu0 %v3812_v1  ;;  %3603 = vmatprep.mubr.msk.bf16.mxu0 %vm3984_vm0, %v3983_v58 }
 0x4ee   :  { %3589 = vmatprep.subr.bf16.mxu0 %v3983_v58 }
 0x4f1   :  { %3590 = vmatpush3.bf16.msra.mxu0 %v3813_v29 }
 0x4f2   :  { %3591 = vmatprep.subr.bf16.mxu0 %v3983_v58 }
 0x4f5   :  { %3592 = vmatpush3.bf16.msra.mxu0 %v3814_v59 }
 0x4f6   :  { %3593 = vmatprep.subr.bf16.mxu0 %v3983_v58 }
 0x4f9   :  { %3594 = vmatpush3.bf16.msra.mxu0 %v3815_v28 }
 0x4fa   :  { %3595 = vmatprep.subr.bf16.mxu0 %v3983_v58 }
 0x4fd   :  { %3596 = vmatpush3.bf16.msra.mxu0 %v3816_v2 }
 0x4fe   :  { %3597 = vmatprep.subr.bf16.mxu0 %v3983_v58 }
 0x501   :  { %3598 = vmatpush3.bf16.msra.mxu0 %v3817_v11 }
 0x502   :  { %3599 = vmatprep.subr.bf16.mxu0 %v3983_v58 }
 0x505   :  { %3600 = vmatpush3.bf16.msra.mxu0 %v3818_v52 }
 0x506   :  { %3601 = vmatprep.subr.bf16.mxu0 %v3983_v58 }
 0x509   :  { %3602 = vmatpush3.bf16.msra.mxu0 %v3819_v15 }
 0x5bf   :  { %v2730_v61 = vpop.f32.mrb[96].mxu0 }
 0x5c0   :  { %v2736_v12 = vpack.c.bf16 %v2730_v61, %v2730_v61  ;;  %v3585_v26 = vpop.f32.mrb[97].mxu0 }
 0x5c1   :  { %v2733_v53 = vpop.f32.mrb[98].mxu0 }
 0x5c2   :  { %v3586_v56 = vpop.f32.mrb[99].mxu0  ;;  %3604 = vmatmul.mubr.bf16.vlgmr.msra.gmra.mrb[100].mxu0 %v2736_v12 }
 0x695   :  { %v2842_v57 = vpop.f32.mrb[100].mxu0 }
 0x696   :  { %v2843_v33 = vadd.f32 %v2964_v19, %v2842_v57  ;;  %v3605_v13 = vpop.f32.mrb[101].mxu0 }
 0x697   :  { %v2845_v35 = vpop.f32.mrb[102].mxu0 }
 0x698   :  { %2848 = vst [vmem:[#allocation11] sm:$0xff] %v2843_v33  ;;  %v3606_v58 = vpop.f32.mrb[103].mxu0 }
 0x699   :  { %3956 = shalt.err (!%p3953_p2)
}
 0x69a   :  { %s3957_s11 = scalar_lea.hbm %s5005_s12, 128 }
 0x69b   :  { %p3958_p3 = scmp.ne.s32.totalorder %s5005_s12, %s3957_s11  ;;  %p3961_p4 = scmp.lt.u32.totalorder %s3957_s11, %s5005_s12 }
 0x69d   :  { %p3963_p5 = pnand %p3961_p4, %p3958_p3 }
 0x69f   :  { %3966 = shalt.err (!%p3963_p5)
}
 0x6a0   :  { %2858 = dma.vmem_to_hbm [thread:$0]  %s2856_s18, 128, %s5005_s12, [#allocation4]  }
 0x6a1   :  { %3973 = dma.done.wait [#allocation4], 128  }
 0x6a2   :  { %3974 = vsyncadd [#allocation4], 4294967168 }
 0x6a3   :  { %2862 = vsyncpa [#allocation3], 1 }
 0x6a4   :  { %2863 = vsyncpa [#allocation6], 1 }
 0x6a5   :  { %2864 = vsyncpa [#allocation9], 1 }
 0x6a6   :  { %2865 = vsyncpa [#allocation4], 1 }

</bundles_post_ra>
